<compile_context>
chip_gen: v6e
topology: v6e:2x2x1
jax: 0.10.0
libtpu: 0.0.40
codegen_flags: <defaults>
</compile_context>

<pallas_src>
import jax
import jax.numpy as jnp
from jax.experimental import pallas as pl
from jax.experimental.pallas import tpu as pltpu


# ---------------------------------------------------------------------------
# Kernel body
# ---------------------------------------------------------------------------
def _mlp_kernel(x_ref, w1_ref, w3_ref, w2_ref, o_ref, acc_ref):
    """gate & up matmuls -> silu*up -> partial down-proj accumulate."""
    j = pl.program_id(1)

    @pl.when(j == 0)
    def _():
        acc_ref[...] = jnp.zeros_like(acc_ref)

    x = x_ref[...]                                                   # (tm, dim)

    # Gate / up projections for this hidden chunk (f32 accumulate on the MXU).
    g = jnp.dot(x, w1_ref[...], preferred_element_type=jnp.float32)  # (tm, th)
    u = jnp.dot(x, w3_ref[...], preferred_element_type=jnp.float32)  # (tm, th)

    # silu(g) * u   (VPU + EUP)
    h = (g * jax.nn.sigmoid(g)) * u

    # Partial down-proj contribution from this hidden chunk.
    acc_ref[...] += jnp.dot(h.astype(w2_ref.dtype), w2_ref[...],
                            preferred_element_type=jnp.float32)      # (tm, dim)

    @pl.when(j == pl.num_programs(1) - 1)
    def _():
        o_ref[...] = acc_ref[...].astype(o_ref.dtype)


# ---------------------------------------------------------------------------
# Tile / VMEM sizing helpers
# ---------------------------------------------------------------------------
def _round_up(x, m):
    return ((x + m - 1) // m) * m


def _device_vmem_bytes():
    try:
        return int(pltpu.get_tpu_info().vmem_capacity_bytes)
    except Exception:
        return 64 << 20   # conservative fallback (v7x per-TC VMEM)


def _footprint_bytes(tm, th, dim, x_isz, w_isz, o_isz):
    """Estimated VMEM footprint for one grid step (double-buffered BlockSpecs)."""
    return (
        2 * tm * dim * x_isz            # x tile
        + 2 * dim * th * w_isz * 2      # w1 + w3 chunks
        + 2 * th * dim * w_isz          # w2 chunk
        + 2 * tm * dim * o_isz          # output tile
        + tm * dim * 4                  # f32 accumulator scratch
        + tm * th * 4 * 3               # f32 g / u / h intermediates
        + (4 << 20)                     # Mosaic internal scratch headroom
    )


def _choose_th(hidden, cap):
    """Largest multiple-of-128 divisor of `hidden` that is <= cap."""
    if hidden % 128 != 0:
        # Full-extent block satisfies the tiling rule for odd hidden sizes.
        # TODO(synk): pad hidden at weight-load time instead for very large hidden.
        return hidden
    t = (min(cap, hidden) // 128) * 128
    while t >= 128:
        if hidden % t == 0:
            return t
        t -= 128
    return hidden


def _choose_tm(M, cap, fits):
    """Pick the M tile: single tile for short sequences, big tiles for prefill."""
    m8 = _round_up(max(M, 1), 8)
    if m8 <= cap and fits(m8):
        return m8
    # Prefill: largest multiple of 256 (MXU-friendly), else multiple of 8, that fits.
    top = min(cap, m8)
    t = (top // 256) * 256
    while t >= 256:
        if fits(t):
            return t
        t -= 256
    t = (top // 8) * 8
    while t >= 8:
        if fits(t):
            return t
        t -= 8
    return 8


# ---------------------------------------------------------------------------
# Host wrapper
# ---------------------------------------------------------------------------
def mistral_mlp(x, w1, w2, w3, *, tm=None, th=None):
    """x: [..., dim] (e.g. ttnn [1,1,seq,dim]); w1,w3: [dim,hidden]; w2: [hidden,dim]."""
    orig_shape = x.shape
    dim = orig_shape[-1]
    hidden = w1.shape[-1]
    x2d = x.reshape(-1, dim)
    M = x2d.shape[0]

    x_isz = jnp.dtype(x2d.dtype).itemsize
    w_isz = jnp.dtype(w1.dtype).itemsize
    o_isz = x_isz

    vmem_cap = _device_vmem_bytes()
    vmem_budget = max(vmem_cap - (8 << 20), 24 << 20)

    # Hidden tile: big (1024) when VMEM allows (v5e/v6e), 512 on small-VMEM parts (v7x).
    if th is None:
        th_cap = 1024 if vmem_cap >= (96 << 20) else 512
        th = _choose_th(hidden, th_cap)
    assert hidden % th == 0, "th must divide hidden"

    # M tile: scale with M (bounded by VMEM) so weights are not re-streamed needlessly.
    if tm is None:
        fits = lambda t: _footprint_bytes(t, th, dim, x_isz, w_isz, o_isz) <= vmem_budget
        tm = _choose_tm(M, 1024, fits)
    assert tm % 8 == 0 or tm == M, "tm must be a multiple of 8"

    # Pad M (activations only — cheap) so the grid is rectangular.
    M_pad = _round_up(max(M, 1), tm)
    if M_pad != M:
        x2d = jnp.pad(x2d, ((0, M_pad - M), (0, 0)))

    grid = (M_pad // tm, hidden // th)

    footprint = _footprint_bytes(tm, th, dim, x_isz, w_isz, o_isz)
    vmem_limit = int(min(max(footprint, 32 << 20), vmem_budget))

    out = pl.pallas_call(
        _mlp_kernel,
        out_shape=jax.ShapeDtypeStruct((M_pad, dim), x.dtype),
        grid_spec=pltpu.PrefetchScalarGridSpec(
            num_scalar_prefetch=0,
            grid=grid,
            in_specs=[
                pl.BlockSpec((tm, dim), lambda i, j: (i, 0)),   # x tile
                pl.BlockSpec((dim, th), lambda i, j: (0, j)),   # w1 (gate) chunk
                pl.BlockSpec((dim, th), lambda i, j: (0, j)),   # w3 (up) chunk
                pl.BlockSpec((th, dim), lambda i, j: (j, 0)),   # w2 (down) chunk
            ],
            out_specs=pl.BlockSpec((tm, dim), lambda i, j: (i, 0)),
            scratch_shapes=[pltpu.VMEM((tm, dim), jnp.float32)],
        ),
        compiler_params=pltpu.CompilerParams(
            dimension_semantics=("parallel", "arbitrary"),
            vmem_limit_bytes=vmem_limit,
        ),
    )(x2d, w1, w3, w2)

    if M_pad != M:
        out = out[:M]
    return out.reshape(orig_shape)


def mistral_mlp_ref(x, w1, w2, w3):
    g = x @ w1
    u = x @ w3
    return (jax.nn.silu(g) * u) @ w2


if __name__ == "__main__":
    # Small, Mistral-like shapes: batch=1, seq=32, dim=256, hidden=512.
    batch, seq, dim, hidden = 1, 32, 256, 512
    key = jax.random.PRNGKey(0)
    kx, k1, k2, k3 = jax.random.split(key, 4)

    # x in ttnn layout [1, 1, seq, dim]
    x = jax.random.normal(kx, (batch, 1, seq, dim), dtype=jnp.float32) * 0.1
    # Pre-transposed weights (as the TT module stores them): linear is x @ W.
    w1 = jax.random.normal(k1, (dim, hidden), dtype=jnp.float32) * 0.05  # gate_proj
    w3 = jax.random.normal(k3, (dim, hidden), dtype=jnp.float32) * 0.05  # up_proj
    w2 = jax.random.normal(k2, (hidden, dim), dtype=jnp.float32) * 0.05  # down_proj

    out = mistral_mlp(x, w1, w2, w3)
    out = jax.block_until_ready(out)

    ref = mistral_mlp_ref(x, w1, w2, w3)
    assert out.shape == x.shape
    assert jnp.allclose(out, ref, atol=1e-4, rtol=1e-4), "mismatch vs reference"

    print("KERNEL_OK")
</pallas_src>

<mosaic_0001>
module attributes {stable_mosaic.version = 11 : i64} {
  func.func @_mlp_kernel(%arg0: i32, %arg1: i32, %arg2: memref<32x256xf32, #tpu.memory_space<vmem>>, %arg3: memref<256x512xf32, #tpu.memory_space<vmem>>, %arg4: memref<256x512xf32, #tpu.memory_space<vmem>>, %arg5: memref<512x256xf32, #tpu.memory_space<vmem>>, %arg6: memref<32x256xf32, #tpu.memory_space<vmem>>, %arg7: memref<32x256xf32, #tpu.memory_space<vmem>>) attributes {dimension_semantics = [#tpu.dimension_semantics<parallel>, #tpu.dimension_semantics<arbitrary>], iteration_bounds = array<i64: 1, 1>, scalar_prefetch = 0 : i64, scratch_operands = 1 : i64, tpu.core_type = #tpu.core_type<tc>, window_params = [{transform_indices = @transform_0, window_bounds = array<i64: 32, 256>}, {transform_indices = @transform_1, window_bounds = array<i64: 256, 512>}, {transform_indices = @transform_2, window_bounds = array<i64: 256, 512>}, {transform_indices = @transform_3, window_bounds = array<i64: 512, 256>}, {transform_indices = @transform_4, window_bounds = array<i64: 32, 256>}]} {
    %c0_i32 = arith.constant 0 : i32
    %0 = arith.cmpi eq, %arg1, %c0_i32 : i32
    %1 = arith.extui %0 : i1 to i32
    %c0_i32_0 = arith.constant 0 : i32
    %2 = arith.cmpi ne, %1, %c0_i32_0 : i32
    scf.if %2 {
      %cst_17 = arith.constant 0.000000e+00 : f32
      %23 = vector.broadcast %cst_17 : f32 to vector<32x256xf32>
      %c0_18 = arith.constant 0 : index
      %c0_19 = arith.constant 0 : index
      %24 = vector.load %arg7[%c0_18, %c0_19] : memref<32x256xf32, #tpu.memory_space<vmem>>, vector<32x256xf32>
      tpu.vector_store %arg7[%c0_18, %c0_19], %23 {strides = array<i32>} : memref<32x256xf32, #tpu.memory_space<vmem>>, vector<32x256xf32>,
    } else {
    }
    %c0 = arith.constant 0 : index
    %c0_1 = arith.constant 0 : index
    %3 = vector.load %arg2[%c0, %c0_1] : memref<32x256xf32, #tpu.memory_space<vmem>>, vector<32x256xf32>
    %c0_2 = arith.constant 0 : index
    %c0_3 = arith.constant 0 : index
    %4 = vector.load %arg3[%c0_2, %c0_3] : memref<256x512xf32, #tpu.memory_space<vmem>>, vector<256x512xf32>
    %cst = arith.constant dense<0.000000e+00> : vector<32x512xf32>
    %5 = tpu.matmul %3, %4, %cst {dimension_numbers = #tpu.dot_dimension_numbers<[1], [0], [0], [1], [0, 0, 1, 1], [], []>} : vector<32x256xf32>, vector<256x512xf32>, vector<32x512xf32> -> vector<32x512xf32>
    %c0_4 = arith.constant 0 : index
    %c0_5 = arith.constant 0 : index
    %6 = vector.load %arg4[%c0_4, %c0_5] : memref<256x512xf32, #tpu.memory_space<vmem>>, vector<256x512xf32>
    %cst_6 = arith.constant dense<0.000000e+00> : vector<32x512xf32>
    %7 = tpu.matmul %3, %6, %cst_6 {dimension_numbers = #tpu.dot_dimension_numbers<[1], [0], [0], [1], [0, 0, 1, 1], [], []>} : vector<32x256xf32>, vector<256x512xf32>, vector<32x512xf32> -> vector<32x512xf32>
    %8 = arith.negf %5 : vector<32x512xf32>
    %9 = math.exp %8 : vector<32x512xf32>
    %cst_7 = arith.constant 1.000000e+00 : f32
    %10 = vector.broadcast %cst_7 : f32 to vector<32x512xf32>
    %11 = arith.addf %10, %9 : vector<32x512xf32>
    %12 = arith.divf %10, %11 : vector<32x512xf32>
    %13 = arith.mulf %5, %12 : vector<32x512xf32>
    %14 = arith.mulf %13, %7 : vector<32x512xf32>
    %c0_8 = arith.constant 0 : index
    %c0_9 = arith.constant 0 : index
    %15 = vector.load %arg7[%c0_8, %c0_9] : memref<32x256xf32, #tpu.memory_space<vmem>>, vector<32x256xf32>
    %c0_10 = arith.constant 0 : index
    %c0_11 = arith.constant 0 : index
    %16 = vector.load %arg5[%c0_10, %c0_11] : memref<512x256xf32, #tpu.memory_space<vmem>>, vector<512x256xf32>
    %cst_12 = arith.constant dense<0.000000e+00> : vector<32x256xf32>
    %17 = tpu.matmul %14, %16, %cst_12 {dimension_numbers = #tpu.dot_dimension_numbers<[1], [0], [0], [1], [0, 0, 1, 1], [], []>} : vector<32x512xf32>, vector<512x256xf32>, vector<32x256xf32> -> vector<32x256xf32>
    %18 = arith.addf %15, %17 : vector<32x256xf32>
    %c0_13 = arith.constant 0 : index
    %c0_14 = arith.constant 0 : index
    %19 = vector.load %arg7[%c0_13, %c0_14] : memref<32x256xf32, #tpu.memory_space<vmem>>, vector<32x256xf32>
    tpu.vector_store %arg7[%c0_13, %c0_14], %18 {strides = array<i32>} : memref<32x256xf32, #tpu.memory_space<vmem>>, vector<32x256xf32>,
    %c0_i32_15 = arith.constant 0 : i32
    %20 = arith.cmpi eq, %arg1, %c0_i32_15 : i32
    %21 = arith.extui %20 : i1 to i32
    %c0_i32_16 = arith.constant 0 : i32
    %22 = arith.cmpi ne, %21, %c0_i32_16 : i32
    scf.if %22 {
      %c0_17 = arith.constant 0 : index
      %c0_18 = arith.constant 0 : index
      %23 = vector.load %arg7[%c0_17, %c0_18] : memref<32x256xf32, #tpu.memory_space<vmem>>, vector<32x256xf32>
      %c0_19 = arith.constant 0 : index
      %c0_20 = arith.constant 0 : index
      %24 = vector.load %arg6[%c0_19, %c0_20] : memref<32x256xf32, #tpu.memory_space<vmem>>, vector<32x256xf32>
      tpu.vector_store %arg6[%c0_19, %c0_20], %23 {strides = array<i32>} : memref<32x256xf32, #tpu.memory_space<vmem>>, vector<32x256xf32>,
    } else {
    }
    return
  }
  func.func @transform_0(%arg0: i32, %arg1: i32) -> (i32, i32) {
    %c0_i32 = arith.constant 0 : i32
    %c0_i32_0 = arith.constant 0 : i32
    return %arg0, %c0_i32 : i32, i32
  }
  func.func @transform_1(%arg0: i32, %arg1: i32) -> (i32, i32) {
    %c0_i32 = arith.constant 0 : i32
    %c0_i32_0 = arith.constant 0 : i32
    return %c0_i32, %arg1 : i32, i32
  }
  func.func @transform_2(%arg0: i32, %arg1: i32) -> (i32, i32) {
    %c0_i32 = arith.constant 0 : i32
    %c0_i32_0 = arith.constant 0 : i32
    return %c0_i32, %arg1 : i32, i32
  }
  func.func @transform_3(%arg0: i32, %arg1: i32) -> (i32, i32) {
    %c0_i32 = arith.constant 0 : i32
    %c0_i32_0 = arith.constant 0 : i32
    return %arg1, %c0_i32 : i32, i32
  }
  func.func @transform_4(%arg0: i32, %arg1: i32) -> (i32, i32) {
    %c0_i32 = arith.constant 0 : i32
    %c0_i32_0 = arith.constant 0 : i32
    return %arg0, %c0_i32 : i32, i32
  }
}

</mosaic_0001>

<bundles_post_ra>
// kernel: tpu_custom_call.1
= control target key start
LH: loop header
LB: loop body
LE: loop exit
PB: predicated region body
PF: predicated region fallthrough
CT: control target
= control target key end

     0   :  { %9 = vsyncpa [#allocation4], 0  ;;  %s1574_s0 = inlined_call_operand.hbm [shape: f32[32,256], index: 0, kind: input, shape index: {}]   ;;  %s1575_s1 = inlined_call_operand.hbm [shape: f32[256,512], index: 1, kind: input, shape index: {}]   ;;  %s1576_s2 = inlined_call_operand.hbm [shape: f32[256,512], index: 2, kind: input, shape index: {}]   ;;  %s1577_s3 = inlined_call_operand.hbm [shape: f32[512,256], index: 3, kind: input, shape index: {}]   ;;  %s1578_s4 = inlined_call_operand.hbm [shape: f32[32,256], index: 4, kind: output, shape index: {}]  }
   0x1   :  { %10 = vsyncpa [#allocation7], 0 }
   0x2   :  { %11 = vsyncpa [#allocation10], 0 }
   0x3   :  { %12 = vsyncpa [#allocation5], 0  ;;  %s1398_s15 = smov [#allocation6]  }
   0x4   :  { %s30_s16 = sshll.u32 %s1398_s15, 4  ;;  %s31_s16 = int_to_ptr.vmem [resolvable:$true] %s30_s16 }
   0x5   :  { %s1298_s17 = scalar_lea.vmem %s31_s16, 16384  ;;  %p1303_p1 = scmp.lt.s32.totalorder %s31_s16, %s31_s16 }
   0x6   :  { %p1299_p0 = scmp.ne.s32.totalorder %s31_s16, %s1298_s17  ;;  %p1304_p2 = scmp.lt.s32.totalorder %s1298_s17, %s1298_s17 }
   0x8   :  { %p1305_p3 = por %p1304_p2, %p1303_p1 }
   0xa   :  { %p1306_p4 = pnand %p1305_p3, %p1299_p0 }
   0xc   :  { %1309 = shalt.err (!%p1306_p4)
}
   0xd   :  { %s1399_s18 = smov 512   ;;  %s1400_s19 = smov 32  }
   0xe   :  { %36 = dma.hbm_to_vmem [thread:$0]  %s1575_s1, 16384, %s31_s16, [#allocation7], %s1399_s18, %s1399_s18, %s1400_s19  }
   0xf   :  { %s1401_s22 = smov [#allocation3]  }
  0x10   :  { %s18_s23 = sshll.u32 %s1401_s22, 4  ;;  %s19_s23 = int_to_ptr.vmem [resolvable:$true] %s18_s23 }
  0x11   :  { %s1318_s24 = scalar_lea.vmem %s19_s23, 1024  ;;  %p1323_p6 = scmp.lt.s32.totalorder %s19_s23, %s19_s23 }
  0x12   :  { %p1319_p5 = scmp.ne.s32.totalorder %s19_s23, %s1318_s24  ;;  %p1324_p7 = scmp.lt.s32.totalorder %s1318_s24, %s1318_s24 }
  0x14   :  { %p1325_p8 = por %p1324_p7, %p1323_p6 }
  0x16   :  { %p1326_p9 = pnand %p1325_p8, %p1319_p5 }
  0x18   :  { %1329 = shalt.err (!%p1326_p9)
}
  0x19   :  { %s1402_s25 = smov 256   ;;  %s1403_s26 = smov 16  }
  0x1a   :  { %24 = dma.hbm_to_vmem [thread:$0]  %s1574_s0, 1024, %s19_s23, [#allocation4], %s1402_s25, %s1402_s25, %s1403_s26  }
  0x1b   :  { %s1404_s1 = smov [#allocation8]   ;;  %s1405_s30 = smov [#allocation9]  }
  0x1c   :  { %s42_s29 = sshll.u32 %s1404_s1, 4  ;;  %s54_s5 = sshll.u32 %s1405_s30, 4  ;;  %s43_s29 = int_to_ptr.vmem [resolvable:$true] %s42_s29  ;;  %s55_s5 = int_to_ptr.vmem [resolvable:$true] %s54_s5 }
  0x1d   :  { %s1338_s6 = scalar_lea.vmem %s43_s29, 16384  ;;  %p1343_p11 = scmp.lt.s32.totalorder %s43_s29, %s43_s29 }
  0x1e   :  { %p1339_p10 = scmp.ne.s32.totalorder %s43_s29, %s1338_s6  ;;  %p1344_p12 = scmp.lt.s32.totalorder %s1338_s6, %s1338_s6 }
  0x20   :  { %p1345_p13 = por %p1344_p12, %p1343_p11 }
  0x22   :  { %p1346_p0 = pnand %p1345_p13, %p1339_p10 }
  0x24   :  { %1349 = shalt.err (!%p1346_p0)
}
  0x25   :  { %48 = dma.hbm_to_vmem [thread:$0]  %s1576_s2, 16384, %s43_s29, [#allocation7], %s1399_s18, %s1399_s18, %s1400_s19  }
  0x26   :  { %s1358_s0 = scalar_lea.vmem %s55_s5, 16384  ;;  %p1363_p2 = scmp.lt.s32.totalorder %s55_s5, %s55_s5 }
  0x27   :  { %p1359_p1 = scmp.ne.s32.totalorder %s55_s5, %s1358_s0  ;;  %p1364_p3 = scmp.lt.s32.totalorder %s1358_s0, %s1358_s0 }
  0x29   :  { %p1365_p4 = por %p1364_p3, %p1363_p2 }
  0x2b   :  { %p1366_p5 = pnand %p1365_p4, %p1359_p1 }
  0x2d   :  { %1369 = shalt.err (!%p1366_p5)
}
  0x2e   :  { %60 = dma.hbm_to_vmem [thread:$0]  %s1577_s3, 16384, %s55_s5, [#allocation10], %s1402_s25, %s1402_s25, %s1403_s26  }
  0x2f   :  { %1390 = dma.done.wait [#allocation4], 1024  }
  0x30   :  { %1391 = vsyncadd [#allocation4], 4294966272 }
  0x31   :  { %1392 = dma.done.wait [#allocation7], 32768  }
  0x32   :  { %1393 = vsyncadd [#allocation7], 4294934528 }
  0x33   :  { %1394 = dma.done.wait [#allocation10], 16384  }
  0x34   :  { %1395 = vsyncadd [#allocation10], 4294950912  ;;  %v154_v0 = vld [vmem:[#allocation6 + $0x1e8] sm:$0xff]  ;;  %v156_v1 = vld [vmem:[#allocation6 + $0x1f8] sm:$0xff]  ;;  %s1406_s2 = smov [#allocation11]  }
  0x35   :  { %v153_v2 = vld [vmem:[#allocation6 + $0x1e0] sm:$0xff]  ;;  %221 = vmatprep.subr.mxu0 %v154_v0  ;;  %310 = vmatprep.subr.mxu1 %v156_v1  ;;  %v155_v3 = vld [vmem:[#allocation6 + $0x1f0] sm:$0xff]  ;;  %v150_v4 = vld [vmem:[#allocation6 + $0x1c8] sm:$0xff]  ;;  %s1187_s3 = sshll.u32 %s1406_s2, 4  ;;  %s1188_s3 = int_to_ptr.vmem [resolvable:$true] %s1187_s3 }
  0x36   :  { %v152_v5 = vld [vmem:[#allocation6 + $0x1d8] sm:$0xff]  ;;  %222 = vmatpush1.msra.mxu0 %v153_v2  ;;  %311 = vmatpush1.msra.mxu1 %v155_v3  ;;  %v149_v6 = vld [vmem:[#allocation6 + $0x1c0] sm:$0xff]  ;;  %v151_v7 = vld [vmem:[#allocation6 + $0x1d0] sm:$0xff]  ;;  %s1370_s11 = scalar_lea.vmem %s1188_s3, 1024  ;;  %p1375_p7 = scmp.lt.s32.totalorder %s1188_s3, %s1188_s3 }
  0x37   :  { %v146_v8 = vld [vmem:[#allocation6 + $0x1a8] sm:$0xff]  ;;  %223 = vmatprep.subr.mxu0 %v150_v4  ;;  %312 = vmatprep.subr.mxu1 %v152_v5  ;;  %v148_v9 = vld [vmem:[#allocation6 + $0x1b8] sm:$0xff]  ;;  %v145_v10 = vld [vmem:[#allocation6 + $0x1a0] sm:$0xff]  ;;  %p1371_p6 = scmp.ne.s32.totalorder %s1188_s3, %s1370_s11  ;;  %p1376_p8 = scmp.lt.s32.totalorder %s1370_s11, %s1370_s11 }
  0x38   :  { %v147_v11 = vld [vmem:[#allocation6 + $0x1b0] sm:$0xff]  ;;  %224 = vmatpush1.msra.mxu0 %v149_v6  ;;  %313 = vmatpush1.msra.mxu1 %v151_v7  ;;  %v142_v12 = vld [vmem:[#allocation6 + $0x188] sm:$0xff]  ;;  %v144_v13 = vld [vmem:[#allocation6 + $0x198] sm:$0xff] }
  0x39   :  { %225 = vmatprep.subr.mxu0 %v146_v8  ;;  %314 = vmatprep.subr.mxu1 %v148_v9  ;;  %v141_v14 = vld [vmem:[#allocation6 + $0x180] sm:$0xff]  ;;  %v143_v15 = vld [vmem:[#allocation6 + $0x190] sm:$0xff]  ;;  %v138_v16 = vld [vmem:[#allocation6 + $0x168] sm:$0xff]  ;;  %p1377_p9 = por %p1376_p8, %p1375_p7 }
  0x3a   :  { %226 = vmatpush1.msra.mxu0 %v145_v10  ;;  %315 = vmatpush1.msra.mxu1 %v147_v11  ;;  %v140_v17 = vld [vmem:[#allocation6 + $0x178] sm:$0xff]  ;;  %v137_v18 = vld [vmem:[#allocation6 + $0x160] sm:$0xff]  ;;  %v139_v19 = vld [vmem:[#allocation6 + $0x170] sm:$0xff] }
  0x3b   :  { %227 = vmatprep.subr.mxu0 %v142_v12  ;;  %316 = vmatprep.subr.mxu1 %v144_v13  ;;  %v134_v20 = vld [vmem:[#allocation6 + $0x148] sm:$0xff]  ;;  %v136_v21 = vld [vmem:[#allocation6 + $0x158] sm:$0xff]  ;;  %v133_v22 = vld [vmem:[#allocation6 + $0x140] sm:$0xff]  ;;  %p1378_p10 = pnand %p1377_p9, %p1371_p6 }
  0x3c   :  { %228 = vmatpush1.msra.mxu0 %v141_v14  ;;  %317 = vmatpush1.msra.mxu1 %v143_v15  ;;  %v135_v23 = vld [vmem:[#allocation6 + $0x150] sm:$0xff]  ;;  %v130_v24 = vld [vmem:[#allocation6 + $0x128] sm:$0xff]  ;;  %v132_v25 = vld [vmem:[#allocation6 + $0x138] sm:$0xff] }
  0x3d   :  { %229 = vmatprep.subr.mxu0 %v138_v16  ;;  %318 = vmatprep.subr.mxu1 %v140_v17  ;;  %v129_v26 = vld [vmem:[#allocation6 + $0x120] sm:$0xff]  ;;  %v131_v27 = vld [vmem:[#allocation6 + $0x130] sm:$0xff]  ;;  %v126_v28 = vld [vmem:[#allocation6 + $0x108] sm:$0xff] }
  0x3e   :  { %230 = vmatpush1.msra.mxu0 %v137_v18  ;;  %319 = vmatpush1.msra.mxu1 %v139_v19  ;;  %v128_v29 = vld [vmem:[#allocation6 + $0x118] sm:$0xff]  ;;  %v125_v30 = vld [vmem:[#allocation6 + $0x100] sm:$0xff]  ;;  %v127_v31 = vld [vmem:[#allocation6 + $0x110] sm:$0xff] }
  0x3f   :  { %231 = vmatprep.subr.mxu0 %v134_v20  ;;  %320 = vmatprep.subr.mxu1 %v136_v21  ;;  %v122_v32 = vld [vmem:[#allocation6 + $0xe8] sm:$0xff]  ;;  %v124_v33 = vld [vmem:[#allocation6 + $0xf8] sm:$0xff]  ;;  %v121_v34 = vld [vmem:[#allocation6 + $0xe0] sm:$0xff] }
  0x40   :  { %232 = vmatpush1.msra.mxu0 %v133_v22  ;;  %321 = vmatpush1.msra.mxu1 %v135_v23  ;;  %v123_v35 = vld [vmem:[#allocation6 + $0xf0] sm:$0xff]  ;;  %v118_v36 = vld [vmem:[#allocation6 + $0xc8] sm:$0xff]  ;;  %v120_v37 = vld [vmem:[#allocation6 + $0xd8] sm:$0xff] }
  0x41   :  { %233 = vmatprep.subr.mxu0 %v130_v24  ;;  %322 = vmatprep.subr.mxu1 %v132_v25  ;;  %v117_v38 = vld [vmem:[#allocation6 + $0xc0] sm:$0xff]  ;;  %v119_v39 = vld [vmem:[#allocation6 + $0xd0] sm:$0xff]  ;;  %v114_v40 = vld [vmem:[#allocation6 + $0xa8] sm:$0xff] }
  0x42   :  { %234 = vmatpush1.msra.mxu0 %v129_v26  ;;  %323 = vmatpush1.msra.mxu1 %v131_v27  ;;  %v116_v41 = vld [vmem:[#allocation6 + $0xb8] sm:$0xff]  ;;  %v113_v42 = vld [vmem:[#allocation6 + $0xa0] sm:$0xff]  ;;  %v115_v43 = vld [vmem:[#allocation6 + $0xb0] sm:$0xff] }
  0x43   :  { %235 = vmatprep.subr.mxu0 %v126_v28  ;;  %324 = vmatprep.subr.mxu1 %v128_v29  ;;  %v110_v44 = vld [vmem:[#allocation6 + $0x88] sm:$0xff]  ;;  %v112_v45 = vld [vmem:[#allocation6 + $0x98] sm:$0xff]  ;;  %v109_v46 = vld [vmem:[#allocation6 + $0x80] sm:$0xff] }
  0x44   :  { %236 = vmatpush1.msra.mxu0 %v125_v30  ;;  %325 = vmatpush1.msra.mxu1 %v127_v31  ;;  %v111_v47 = vld [vmem:[#allocation6 + $0x90] sm:$0xff]  ;;  %v106_v48 = vld [vmem:[#allocation6 + $0x68] sm:$0xff]  ;;  %v108_v49 = vld [vmem:[#allocation6 + $0x78] sm:$0xff] }
  0x45   :  { %237 = vmatprep.subr.mxu0 %v122_v32  ;;  %326 = vmatprep.subr.mxu1 %v124_v33  ;;  %v105_v50 = vld [vmem:[#allocation6 + $0x60] sm:$0xff]  ;;  %v107_v51 = vld [vmem:[#allocation6 + $0x70] sm:$0xff]  ;;  %v102_v52 = vld [vmem:[#allocation6 + $0x48] sm:$0xff] }
  0x46   :  { %238 = vmatpush1.msra.mxu0 %v121_v34  ;;  %327 = vmatpush1.msra.mxu1 %v123_v35  ;;  %v104_v53 = vld [vmem:[#allocation6 + $0x58] sm:$0xff]  ;;  %v101_v54 = vld [vmem:[#allocation6 + $0x40] sm:$0xff]  ;;  %v103_v55 = vld [vmem:[#allocation6 + $0x50] sm:$0xff] }
  0x47   :  { %239 = vmatprep.subr.mxu0 %v118_v36  ;;  %328 = vmatprep.subr.mxu1 %v120_v37  ;;  %v98_v56 = vld [vmem:[#allocation6 + $0x28] sm:$0xff]  ;;  %v100_v57 = vld [vmem:[#allocation6 + $0x38] sm:$0xff]  ;;  %v97_v58 = vld [vmem:[#allocation6 + $0x20] sm:$0xff] }
  0x48   :  { %240 = vmatpush1.msra.mxu0 %v117_v38  ;;  %329 = vmatpush1.msra.mxu1 %v119_v39  ;;  %v99_v59 = vld [vmem:[#allocation6 + $0x30] sm:$0xff]  ;;  %v94_v60 = vld [vmem:[#allocation6 + $0x8] sm:$0xff]  ;;  %v96_v61 = vld [vmem:[#allocation6 + $0x18] sm:$0xff] }
  0x49   :  { %241 = vmatprep.subr.mxu0 %v114_v40  ;;  %330 = vmatprep.subr.mxu1 %v116_v41  ;;  %v93_v62 = vld [vmem:[#allocation6] sm:$0xff]  ;;  %v95_v63 = vld [vmem:[#allocation6 + $0x10] sm:$0xff]  ;;  %v218_v0 = vld [vmem:[#allocation6 + $0x3e8] sm:$0xff] }
  0x4a   :  { %242 = vmatpush1.msra.mxu0 %v113_v42  ;;  %331 = vmatpush1.msra.mxu1 %v115_v43  ;;  %v220_v1 = vld [vmem:[#allocation6 + $0x3f8] sm:$0xff]  ;;  %v217_v2 = vld [vmem:[#allocation6 + $0x3e0] sm:$0xff]  ;;  %v219_v3 = vld [vmem:[#allocation6 + $0x3f0] sm:$0xff] }
  0x4b   :  { %243 = vmatprep.subr.mxu0 %v110_v44  ;;  %332 = vmatprep.subr.mxu1 %v112_v45  ;;  %v214_v4 = vld [vmem:[#allocation6 + $0x3c8] sm:$0xff]  ;;  %v216_v5 = vld [vmem:[#allocation6 + $0x3d8] sm:$0xff]  ;;  %v213_v6 = vld [vmem:[#allocation6 + $0x3c0] sm:$0xff] }
  0x4c   :  { %244 = vmatpush1.msra.mxu0 %v109_v46  ;;  %333 = vmatpush1.msra.mxu1 %v111_v47  ;;  %v215_v7 = vld [vmem:[#allocation6 + $0x3d0] sm:$0xff]  ;;  %v210_v8 = vld [vmem:[#allocation6 + $0x3a8] sm:$0xff]  ;;  %v212_v9 = vld [vmem:[#allocation6 + $0x3b8] sm:$0xff] }
  0x4d   :  { %245 = vmatprep.subr.mxu0 %v106_v48  ;;  %334 = vmatprep.subr.mxu1 %v108_v49  ;;  %v209_v10 = vld [vmem:[#allocation6 + $0x3a0] sm:$0xff]  ;;  %v211_v11 = vld [vmem:[#allocation6 + $0x3b0] sm:$0xff]  ;;  %v206_v12 = vld [vmem:[#allocation6 + $0x388] sm:$0xff] }
  0x4e   :  { %246 = vmatpush1.msra.mxu0 %v105_v50  ;;  %335 = vmatpush1.msra.mxu1 %v107_v51  ;;  %v208_v13 = vld [vmem:[#allocation6 + $0x398] sm:$0xff]  ;;  %v205_v14 = vld [vmem:[#allocation6 + $0x380] sm:$0xff]  ;;  %v207_v15 = vld [vmem:[#allocation6 + $0x390] sm:$0xff] }
  0x4f   :  { %247 = vmatprep.subr.mxu0 %v102_v52  ;;  %336 = vmatprep.subr.mxu1 %v104_v53  ;;  %v202_v16 = vld [vmem:[#allocation6 + $0x368] sm:$0xff]  ;;  %v204_v17 = vld [vmem:[#allocation6 + $0x378] sm:$0xff]  ;;  %v201_v18 = vld [vmem:[#allocation6 + $0x360] sm:$0xff] }
  0x50   :  { %248 = vmatpush1.msra.mxu0 %v101_v54  ;;  %337 = vmatpush1.msra.mxu1 %v103_v55  ;;  %v203_v19 = vld [vmem:[#allocation6 + $0x370] sm:$0xff]  ;;  %v198_v20 = vld [vmem:[#allocation6 + $0x348] sm:$0xff]  ;;  %v200_v21 = vld [vmem:[#allocation6 + $0x358] sm:$0xff] }
  0x51   :  { %249 = vmatprep.subr.mxu0 %v98_v56  ;;  %338 = vmatprep.subr.mxu1 %v100_v57  ;;  %v197_v22 = vld [vmem:[#allocation6 + $0x340] sm:$0xff]  ;;  %v199_v23 = vld [vmem:[#allocation6 + $0x350] sm:$0xff]  ;;  %v194_v24 = vld [vmem:[#allocation6 + $0x328] sm:$0xff] }
  0x52   :  { %250 = vmatpush1.msra.mxu0 %v97_v58  ;;  %339 = vmatpush1.msra.mxu1 %v99_v59  ;;  %v196_v25 = vld [vmem:[#allocation6 + $0x338] sm:$0xff]  ;;  %v193_v26 = vld [vmem:[#allocation6 + $0x320] sm:$0xff]  ;;  %v195_v27 = vld [vmem:[#allocation6 + $0x330] sm:$0xff] }
  0x53   :  { %251 = vmatprep.subr.mxu0 %v94_v60  ;;  %340 = vmatprep.subr.mxu1 %v96_v61  ;;  %v190_v28 = vld [vmem:[#allocation6 + $0x308] sm:$0xff]  ;;  %v192_v29 = vld [vmem:[#allocation6 + $0x318] sm:$0xff]  ;;  %v189_v30 = vld [vmem:[#allocation6 + $0x300] sm:$0xff] }
  0x54   :  { %252 = vmatpush1.msra.mxu0 %v93_v62  ;;  %341 = vmatpush1.msra.mxu1 %v95_v63  ;;  %v191_v31 = vld [vmem:[#allocation6 + $0x310] sm:$0xff]  ;;  %v186_v32 = vld [vmem:[#allocation6 + $0x2e8] sm:$0xff]  ;;  %v188_v33 = vld [vmem:[#allocation6 + $0x2f8] sm:$0xff] }
  0x55   :  { %253 = vmatprep.subr.mxu0 %v218_v0  ;;  %342 = vmatprep.subr.mxu1 %v220_v1  ;;  %v185_v34 = vld [vmem:[#allocation6 + $0x2e0] sm:$0xff]  ;;  %v187_v35 = vld [vmem:[#allocation6 + $0x2f0] sm:$0xff]  ;;  %v182_v36 = vld [vmem:[#allocation6 + $0x2c8] sm:$0xff] }
  0x56   :  { %254 = vmatpush2.msra.mxu0 %v217_v2  ;;  %343 = vmatpush2.msra.mxu1 %v219_v3  ;;  %v184_v37 = vld [vmem:[#allocation6 + $0x2d8] sm:$0xff]  ;;  %v181_v38 = vld [vmem:[#allocation6 + $0x2c0] sm:$0xff]  ;;  %v183_v39 = vld [vmem:[#allocation6 + $0x2d0] sm:$0xff] }
  0x57   :  { %255 = vmatprep.subr.mxu0 %v214_v4  ;;  %344 = vmatprep.subr.mxu1 %v216_v5  ;;  %v178_v40 = vld [vmem:[#allocation6 + $0x2a8] sm:$0xff]  ;;  %v180_v41 = vld [vmem:[#allocation6 + $0x2b8] sm:$0xff]  ;;  %v177_v42 = vld [vmem:[#allocation6 + $0x2a0] sm:$0xff] }
  0x58   :  { %256 = vmatpush2.msra.mxu0 %v213_v6  ;;  %345 = vmatpush2.msra.mxu1 %v215_v7  ;;  %v179_v43 = vld [vmem:[#allocation6 + $0x2b0] sm:$0xff]  ;;  %v174_v44 = vld [vmem:[#allocation6 + $0x288] sm:$0xff]  ;;  %v176_v45 = vld [vmem:[#allocation6 + $0x298] sm:$0xff] }
  0x59   :  { %257 = vmatprep.subr.mxu0 %v210_v8  ;;  %346 = vmatprep.subr.mxu1 %v212_v9  ;;  %v173_v46 = vld [vmem:[#allocation6 + $0x280] sm:$0xff]  ;;  %v175_v47 = vld [vmem:[#allocation6 + $0x290] sm:$0xff]  ;;  %v170_v48 = vld [vmem:[#allocation6 + $0x268] sm:$0xff] }
  0x5a   :  { %258 = vmatpush2.msra.mxu0 %v209_v10  ;;  %347 = vmatpush2.msra.mxu1 %v211_v11  ;;  %v172_v49 = vld [vmem:[#allocation6 + $0x278] sm:$0xff]  ;;  %v169_v50 = vld [vmem:[#allocation6 + $0x260] sm:$0xff]  ;;  %v171_v51 = vld [vmem:[#allocation6 + $0x270] sm:$0xff] }
  0x5b   :  { %259 = vmatprep.subr.mxu0 %v206_v12  ;;  %348 = vmatprep.subr.mxu1 %v208_v13  ;;  %v166_v52 = vld [vmem:[#allocation6 + $0x248] sm:$0xff]  ;;  %v168_v53 = vld [vmem:[#allocation6 + $0x258] sm:$0xff]  ;;  %v165_v54 = vld [vmem:[#allocation6 + $0x240] sm:$0xff] }
  0x5c   :  { %260 = vmatpush2.msra.mxu0 %v205_v14  ;;  %349 = vmatpush2.msra.mxu1 %v207_v15  ;;  %v167_v55 = vld [vmem:[#allocation6 + $0x250] sm:$0xff]  ;;  %v162_v56 = vld [vmem:[#allocation6 + $0x228] sm:$0xff]  ;;  %v164_v57 = vld [vmem:[#allocation6 + $0x238] sm:$0xff] }
  0x5d   :  { %261 = vmatprep.subr.mxu0 %v202_v16  ;;  %350 = vmatprep.subr.mxu1 %v204_v17  ;;  %v161_v58 = vld [vmem:[#allocation6 + $0x220] sm:$0xff]  ;;  %v163_v59 = vld [vmem:[#allocation6 + $0x230] sm:$0xff]  ;;  %v158_v60 = vld [vmem:[#allocation6 + $0x208] sm:$0xff] }
  0x5e   :  { %262 = vmatpush2.msra.mxu0 %v201_v18  ;;  %351 = vmatpush2.msra.mxu1 %v203_v19  ;;  %v160_v61 = vld [vmem:[#allocation6 + $0x218] sm:$0xff]  ;;  %v157_v62 = vld [vmem:[#allocation6 + $0x200] sm:$0xff]  ;;  %v1456_v63 = vld [vmem:[#allocation3 + $0x8] sm:$0xff] }
  0x5f   :  { %263 = vmatprep.subr.mxu0 %v198_v20  ;;  %352 = vmatprep.subr.mxu1 %v200_v21  ;;  %v159_v0 = vld [vmem:[#allocation6 + $0x210] sm:$0xff]  ;;  %v1458_v1 = vld [vmem:[#allocation3] sm:$0xff]  ;;  %v460_v2 = vld [vmem:[#allocation8 + $0x1e8] sm:$0xff] }
  0x60   :  { %264 = vmatpush2.msra.mxu0 %v197_v22  ;;  %353 = vmatpush2.msra.mxu1 %v199_v23  ;;  %v462_v3 = vld [vmem:[#allocation8 + $0x1f8] sm:$0xff]  ;;  %v459_v4 = vld [vmem:[#allocation8 + $0x1e0] sm:$0xff]  ;;  %v461_v5 = vld [vmem:[#allocation8 + $0x1f0] sm:$0xff] }
  0x61   :  { %265 = vmatprep.subr.mxu0 %v194_v24  ;;  %354 = vmatprep.subr.mxu1 %v196_v25  ;;  %v456_v6 = vld [vmem:[#allocation8 + $0x1c8] sm:$0xff]  ;;  %v458_v7 = vld [vmem:[#allocation8 + $0x1d8] sm:$0xff]  ;;  %v455_v9 = vld [vmem:[#allocation8 + $0x1c0] sm:$0xff] }
  0x62   :  { %266 = vmatpush2.msra.mxu0 %v193_v26  ;;  %355 = vmatpush2.msra.mxu1 %v195_v27  ;;  %v1464_v8 = vld [vmem:[#allocation3 + $0x18] sm:$0xff]  ;;  %v457_v10 = vld [vmem:[#allocation8 + $0x1d0] sm:$0xff]  ;;  %v452_v12 = vld [vmem:[#allocation8 + $0x1a8] sm:$0xff] }
  0x63   :  { %267 = vmatprep.subr.mxu0 %v190_v28  ;;  %356 = vmatprep.subr.mxu1 %v192_v29  ;;  %v1466_v11 = vld [vmem:[#allocation3 + $0x10] sm:$0xff]  ;;  %v454_v13 = vld [vmem:[#allocation8 + $0x1b8] sm:$0xff]  ;;  %v451_v14 = vld [vmem:[#allocation8 + $0x1a0] sm:$0xff] }
  0x64   :  { %268 = vmatpush2.msra.mxu0 %v189_v30  ;;  %357 = vmatpush2.msra.mxu1 %v191_v31  ;;  %v453_v15 = vld [vmem:[#allocation8 + $0x1b0] sm:$0xff]  ;;  %v448_v16 = vld [vmem:[#allocation8 + $0x188] sm:$0xff]  ;;  %v450_v17 = vld [vmem:[#allocation8 + $0x198] sm:$0xff] }
  0x65   :  { %269 = vmatprep.subr.mxu0 %v186_v32  ;;  %358 = vmatprep.subr.mxu1 %v188_v33  ;;  %v1472_v18 = vld [vmem:[#allocation3 + $0x28] sm:$0xff]  ;;  %v447_v19 = vld [vmem:[#allocation8 + $0x180] sm:$0xff]  ;;  %v449_v20 = vld [vmem:[#allocation8 + $0x190] sm:$0xff] }
  0x66   :  { %270 = vmatpush2.msra.mxu0 %v185_v34  ;;  %359 = vmatpush2.msra.mxu1 %v187_v35  ;;  %v1474_v21 = vld [vmem:[#allocation3 + $0x20] sm:$0xff]  ;;  %v444_v22 = vld [vmem:[#allocation8 + $0x168] sm:$0xff]  ;;  %v446_v23 = vld [vmem:[#allocation8 + $0x178] sm:$0xff] }
  0x67   :  { %271 = vmatprep.subr.mxu0 %v182_v36  ;;  %360 = vmatprep.subr.mxu1 %v184_v37  ;;  %v443_v24 = vld [vmem:[#allocation8 + $0x160] sm:$0xff]  ;;  %v445_v25 = vld [vmem:[#allocation8 + $0x170] sm:$0xff]  ;;  %v440_v26 = vld [vmem:[#allocation8 + $0x148] sm:$0xff] }
  0x68   :  { %272 = vmatpush2.msra.mxu0 %v181_v38  ;;  %361 = vmatpush2.msra.mxu1 %v183_v39  ;;  %v442_v27 = vld [vmem:[#allocation8 + $0x158] sm:$0xff]  ;;  %v439_v29 = vld [vmem:[#allocation8 + $0x140] sm:$0xff]  ;;  %v441_v30 = vld [vmem:[#allocation8 + $0x150] sm:$0xff] }
  0x69   :  { %273 = vmatprep.subr.mxu0 %v178_v40  ;;  %362 = vmatprep.subr.mxu1 %v180_v41  ;;  %v1480_v28 = vld [vmem:[#allocation3 + $0x38] sm:$0xff]  ;;  %v1482_v31 = vld [vmem:[#allocation3 + $0x30] sm:$0xff]  ;;  %v436_v32 = vld [vmem:[#allocation8 + $0x128] sm:$0xff] }
  0x6a   :  { %274 = vmatpush2.msra.mxu0 %v177_v42  ;;  %363 = vmatpush2.msra.mxu1 %v179_v43  ;;  %v438_v33 = vld [vmem:[#allocation8 + $0x138] sm:$0xff]  ;;  %v435_v34 = vld [vmem:[#allocation8 + $0x120] sm:$0xff]  ;;  %v437_v35 = vld [vmem:[#allocation8 + $0x130] sm:$0xff] }
  0x6b   :  { %275 = vmatprep.subr.mxu0 %v174_v44  ;;  %364 = vmatprep.subr.mxu1 %v176_v45  ;;  %v432_v36 = vld [vmem:[#allocation8 + $0x108] sm:$0xff]  ;;  %v434_v37 = vld [vmem:[#allocation8 + $0x118] sm:$0xff]  ;;  %v431_v38 = vld [vmem:[#allocation8 + $0x100] sm:$0xff] }
  0x6c   :  { %276 = vmatpush2.msra.mxu0 %v173_v46  ;;  %365 = vmatpush2.msra.mxu1 %v175_v47  ;;  %v433_v39 = vld [vmem:[#allocation8 + $0x110] sm:$0xff]  ;;  %v428_v40 = vld [vmem:[#allocation8 + $0xe8] sm:$0xff]  ;;  %v430_v41 = vld [vmem:[#allocation8 + $0xf8] sm:$0xff] }
  0x6d   :  { %277 = vmatprep.subr.mxu0 %v170_v48  ;;  %366 = vmatprep.subr.mxu1 %v172_v49  ;;  %v427_v42 = vld [vmem:[#allocation8 + $0xe0] sm:$0xff]  ;;  %v429_v43 = vld [vmem:[#allocation8 + $0xf0] sm:$0xff]  ;;  %v424_v44 = vld [vmem:[#allocation8 + $0xc8] sm:$0xff] }
  0x6e   :  { %278 = vmatpush2.msra.mxu0 %v169_v50  ;;  %367 = vmatpush2.msra.mxu1 %v171_v51  ;;  %v426_v45 = vld [vmem:[#allocation8 + $0xd8] sm:$0xff]  ;;  %v423_v46 = vld [vmem:[#allocation8 + $0xc0] sm:$0xff]  ;;  %v425_v47 = vld [vmem:[#allocation8 + $0xd0] sm:$0xff] }
  0x6f   :  { %279 = vmatprep.subr.mxu0 %v166_v52  ;;  %368 = vmatprep.subr.mxu1 %v168_v53  ;;  %v420_v48 = vld [vmem:[#allocation8 + $0xa8] sm:$0xff]  ;;  %v422_v49 = vld [vmem:[#allocation8 + $0xb8] sm:$0xff]  ;;  %v419_v50 = vld [vmem:[#allocation8 + $0xa0] sm:$0xff] }
  0x70   :  { %280 = vmatpush2.msra.mxu0 %v165_v54  ;;  %369 = vmatpush2.msra.mxu1 %v167_v55  ;;  %v421_v51 = vld [vmem:[#allocation8 + $0xb0] sm:$0xff]  ;;  %v416_v52 = vld [vmem:[#allocation8 + $0x88] sm:$0xff]  ;;  %v418_v53 = vld [vmem:[#allocation8 + $0x98] sm:$0xff] }
  0x71   :  { %281 = vmatprep.subr.mxu0 %v162_v56  ;;  %370 = vmatprep.subr.mxu1 %v164_v57  ;;  %v415_v54 = vld [vmem:[#allocation8 + $0x80] sm:$0xff]  ;;  %v417_v55 = vld [vmem:[#allocation8 + $0x90] sm:$0xff]  ;;  %v412_v56 = vld [vmem:[#allocation8 + $0x68] sm:$0xff] }
  0x72   :  { %282 = vmatpush2.msra.mxu0 %v161_v58  ;;  %371 = vmatpush2.msra.mxu1 %v163_v59  ;;  %v414_v57 = vld [vmem:[#allocation8 + $0x78] sm:$0xff]  ;;  %v411_v58 = vld [vmem:[#allocation8 + $0x60] sm:$0xff]  ;;  %v413_v59 = vld [vmem:[#allocation8 + $0x70] sm:$0xff] }
  0x73   :  { %283 = vmatprep.subr.mxu0 %v158_v60  ;;  %372 = vmatprep.subr.mxu1 %v160_v61  ;;  %v408_v60 = vld [vmem:[#allocation8 + $0x48] sm:$0xff]  ;;  %v410_v61 = vld [vmem:[#allocation8 + $0x58] sm:$0xff] }
  0x74   :  { %284 = vmatpush2.msra.mxu0 %v157_v62  ;;  %285 = vmatprep.mubr.f32.mxu0 %v1456_v63  ;;  %v407_v62 = vld [vmem:[#allocation8 + $0x40] sm:$0xff] }
  0x75   :  { %373 = vmatpush2.msra.mxu1 %v159_v0  ;;  %374 = vmatprep.mubr.f32.mxu1 %v1456_v63  ;;  %v409_v0 = vld [vmem:[#allocation8 + $0x50] sm:$0xff] }
  0x76   :  { %286 = vmatmul.mubr.f32.vlgmr.msra.gmra.mxu0 %v1458_v1  ;;  %375 = vmatmul.mubr.f32.vlgmr.msra.gmra.mxu1 %v1458_v1 }
  0x77   :  { %527 = vmatprep.subr.mxu0 %v460_v2  ;;  %616 = vmatprep.subr.mxu1 %v462_v3  ;;  %v404_v2 = vld [vmem:[#allocation8 + $0x28] sm:$0xff]  ;;  %v406_v3 = vld [vmem:[#allocation8 + $0x38] sm:$0xff] }
  0x78   :  { %528 = vmatpush1.msra.mxu0 %v459_v4  ;;  %617 = vmatpush1.msra.mxu1 %v461_v5  ;;  %v403_v4 = vld [vmem:[#allocation8 + $0x20] sm:$0xff]  ;;  %v405_v5 = vld [vmem:[#allocation8 + $0x30] sm:$0xff] }
  0x79   :  { %529 = vmatprep.subr.mxu0 %v456_v6  ;;  %618 = vmatprep.subr.mxu1 %v458_v7  ;;  %v400_v6 = vld [vmem:[#allocation8 + $0x8] sm:$0xff]  ;;  %v402_v7 = vld [vmem:[#allocation8 + $0x18] sm:$0xff] }
  0x7a   :  { %291 = vmatprep.mubr.f32.mxu0 %v1464_v8  ;;  %380 = vmatprep.mubr.f32.mxu1 %v1464_v8 }
  0x7b   :  { %530 = vmatpush1.msra.mxu0 %v455_v9  ;;  %619 = vmatpush1.msra.mxu1 %v457_v10  ;;  %v399_v9 = vld [vmem:[#allocation8] sm:$0xff]  ;;  %v401_v10 = vld [vmem:[#allocation8 + $0x10] sm:$0xff] }
  0x7c   :  { %292 = vmatmul.mubr.f32.gmra.mxu0 %v1466_v11  ;;  %381 = vmatmul.mubr.f32.gmra.mxu1 %v1466_v11 }
  0x7d   :  { %531 = vmatprep.subr.mxu0 %v452_v12  ;;  %620 = vmatprep.subr.mxu1 %v454_v13  ;;  %v524_v12 = vld [vmem:[#allocation8 + $0x3e8] sm:$0xff]  ;;  %v526_v13 = vld [vmem:[#allocation8 + $0x3f8] sm:$0xff] }
  0x7e   :  { %532 = vmatpush1.msra.mxu0 %v451_v14  ;;  %621 = vmatpush1.msra.mxu1 %v453_v15  ;;  %v523_v14 = vld [vmem:[#allocation8 + $0x3e0] sm:$0xff]  ;;  %v525_v15 = vld [vmem:[#allocation8 + $0x3f0] sm:$0xff] }
  0x7f   :  { %533 = vmatprep.subr.mxu0 %v448_v16  ;;  %622 = vmatprep.subr.mxu1 %v450_v17  ;;  %v520_v16 = vld [vmem:[#allocation8 + $0x3c8] sm:$0xff]  ;;  %v522_v17 = vld [vmem:[#allocation8 + $0x3d8] sm:$0xff] }
  0x80   :  { %297 = vmatprep.mubr.f32.mxu0 %v1472_v18  ;;  %386 = vmatprep.mubr.f32.mxu1 %v1472_v18 }
  0x81   :  { %534 = vmatpush1.msra.mxu0 %v447_v19  ;;  %623 = vmatpush1.msra.mxu1 %v449_v20  ;;  %v519_v19 = vld [vmem:[#allocation8 + $0x3c0] sm:$0xff]  ;;  %v521_v20 = vld [vmem:[#allocation8 + $0x3d0] sm:$0xff] }
  0x82   :  { %298 = vmatmul.mubr.f32.gmra.mxu0 %v1474_v21  ;;  %387 = vmatmul.mubr.f32.gmra.mxu1 %v1474_v21 }
  0x83   :  { %535 = vmatprep.subr.mxu0 %v444_v22  ;;  %624 = vmatprep.subr.mxu1 %v446_v23  ;;  %v516_v22 = vld [vmem:[#allocation8 + $0x3a8] sm:$0xff]  ;;  %v518_v23 = vld [vmem:[#allocation8 + $0x3b8] sm:$0xff] }
  0x84   :  { %536 = vmatpush1.msra.mxu0 %v443_v24  ;;  %625 = vmatpush1.msra.mxu1 %v445_v25  ;;  %v515_v24 = vld [vmem:[#allocation8 + $0x3a0] sm:$0xff]  ;;  %v517_v25 = vld [vmem:[#allocation8 + $0x3b0] sm:$0xff] }
  0x85   :  { %537 = vmatprep.subr.mxu0 %v440_v26  ;;  %626 = vmatprep.subr.mxu1 %v442_v27  ;;  %v512_v26 = vld [vmem:[#allocation8 + $0x388] sm:$0xff]  ;;  %v514_v27 = vld [vmem:[#allocation8 + $0x398] sm:$0xff] }
  0x86   :  { %303 = vmatprep.mubr.f32.mxu0 %v1480_v28  ;;  %392 = vmatprep.mubr.f32.mxu1 %v1480_v28 }
  0x87   :  { %538 = vmatpush1.msra.mxu0 %v439_v29  ;;  %627 = vmatpush1.msra.mxu1 %v441_v30  ;;  %v511_v29 = vld [vmem:[#allocation8 + $0x380] sm:$0xff]  ;;  %v513_v30 = vld [vmem:[#allocation8 + $0x390] sm:$0xff] }
  0x88   :  { %304 = vmatmul.mubr.f32.gmra.mxu0 %v1482_v31  ;;  %393 = vmatmul.mubr.f32.gmra.mxu1 %v1482_v31 }
  0x89   :  { %539 = vmatprep.subr.mxu0 %v436_v32  ;;  %628 = vmatprep.subr.mxu1 %v438_v33  ;;  %v508_v32 = vld [vmem:[#allocation8 + $0x368] sm:$0xff]  ;;  %v510_v33 = vld [vmem:[#allocation8 + $0x378] sm:$0xff] }
  0x8a   :  { %540 = vmatpush1.msra.mxu0 %v435_v34  ;;  %629 = vmatpush1.msra.mxu1 %v437_v35  ;;  %v507_v34 = vld [vmem:[#allocation8 + $0x360] sm:$0xff]  ;;  %v509_v35 = vld [vmem:[#allocation8 + $0x370] sm:$0xff] }
  0x8b   :  { %541 = vmatprep.subr.mxu0 %v432_v36  ;;  %630 = vmatprep.subr.mxu1 %v434_v37  ;;  %v504_v36 = vld [vmem:[#allocation8 + $0x348] sm:$0xff]  ;;  %v506_v37 = vld [vmem:[#allocation8 + $0x358] sm:$0xff] }
  0x8c   :  { %542 = vmatpush1.msra.mxu0 %v431_v38  ;;  %631 = vmatpush1.msra.mxu1 %v433_v39  ;;  %v503_v38 = vld [vmem:[#allocation8 + $0x340] sm:$0xff]  ;;  %v505_v39 = vld [vmem:[#allocation8 + $0x350] sm:$0xff] }
  0x8d   :  { %543 = vmatprep.subr.mxu0 %v428_v40  ;;  %632 = vmatprep.subr.mxu1 %v430_v41  ;;  %v500_v40 = vld [vmem:[#allocation8 + $0x328] sm:$0xff]  ;;  %v502_v41 = vld [vmem:[#allocation8 + $0x338] sm:$0xff] }
  0x8e   :  { %544 = vmatpush1.msra.mxu0 %v427_v42  ;;  %633 = vmatpush1.msra.mxu1 %v429_v43  ;;  %v499_v42 = vld [vmem:[#allocation8 + $0x320] sm:$0xff]  ;;  %v501_v43 = vld [vmem:[#allocation8 + $0x330] sm:$0xff] }
  0x8f   :  { %545 = vmatprep.subr.mxu0 %v424_v44  ;;  %634 = vmatprep.subr.mxu1 %v426_v45  ;;  %v496_v44 = vld [vmem:[#allocation8 + $0x308] sm:$0xff]  ;;  %v498_v45 = vld [vmem:[#allocation8 + $0x318] sm:$0xff] }
  0x90   :  { %546 = vmatpush1.msra.mxu0 %v423_v46  ;;  %635 = vmatpush1.msra.mxu1 %v425_v47  ;;  %v495_v46 = vld [vmem:[#allocation8 + $0x300] sm:$0xff]  ;;  %v497_v47 = vld [vmem:[#allocation8 + $0x310] sm:$0xff] }
  0x91   :  { %547 = vmatprep.subr.mxu0 %v420_v48  ;;  %636 = vmatprep.subr.mxu1 %v422_v49  ;;  %v492_v48 = vld [vmem:[#allocation8 + $0x2e8] sm:$0xff]  ;;  %v494_v49 = vld [vmem:[#allocation8 + $0x2f8] sm:$0xff] }
  0x92   :  { %548 = vmatpush1.msra.mxu0 %v419_v50  ;;  %637 = vmatpush1.msra.mxu1 %v421_v51  ;;  %v491_v50 = vld [vmem:[#allocation8 + $0x2e0] sm:$0xff]  ;;  %v493_v51 = vld [vmem:[#allocation8 + $0x2f0] sm:$0xff] }
  0x93   :  { %549 = vmatprep.subr.mxu0 %v416_v52  ;;  %638 = vmatprep.subr.mxu1 %v418_v53  ;;  %v488_v52 = vld [vmem:[#allocation8 + $0x2c8] sm:$0xff]  ;;  %v490_v53 = vld [vmem:[#allocation8 + $0x2d8] sm:$0xff] }
  0x94   :  { %550 = vmatpush1.msra.mxu0 %v415_v54  ;;  %639 = vmatpush1.msra.mxu1 %v417_v55  ;;  %v487_v54 = vld [vmem:[#allocation8 + $0x2c0] sm:$0xff]  ;;  %v489_v55 = vld [vmem:[#allocation8 + $0x2d0] sm:$0xff] }
  0x95   :  { %551 = vmatprep.subr.mxu0 %v412_v56  ;;  %640 = vmatprep.subr.mxu1 %v414_v57  ;;  %v484_v56 = vld [vmem:[#allocation8 + $0x2a8] sm:$0xff]  ;;  %v486_v57 = vld [vmem:[#allocation8 + $0x2b8] sm:$0xff] }
  0x96   :  { %552 = vmatpush1.msra.mxu0 %v411_v58  ;;  %641 = vmatpush1.msra.mxu1 %v413_v59  ;;  %v483_v58 = vld [vmem:[#allocation8 + $0x2a0] sm:$0xff]  ;;  %v485_v59 = vld [vmem:[#allocation8 + $0x2b0] sm:$0xff] }
  0x97   :  { %553 = vmatprep.subr.mxu0 %v408_v60  ;;  %642 = vmatprep.subr.mxu1 %v410_v61  ;;  %v480_v60 = vld [vmem:[#allocation8 + $0x288] sm:$0xff]  ;;  %v482_v61 = vld [vmem:[#allocation8 + $0x298] sm:$0xff] }
  0x98   :  { %554 = vmatpush1.msra.mxu0 %v407_v62  ;;  %643 = vmatpush1.msra.mxu1 %v409_v0  ;;  %v479_v62 = vld [vmem:[#allocation8 + $0x280] sm:$0xff]  ;;  %v481_v0 = vld [vmem:[#allocation8 + $0x290] sm:$0xff] }
  0x99   :  { %555 = vmatprep.subr.mxu0 %v404_v2  ;;  %644 = vmatprep.subr.mxu1 %v406_v3  ;;  %v476_v2 = vld [vmem:[#allocation8 + $0x268] sm:$0xff]  ;;  %v478_v3 = vld [vmem:[#allocation8 + $0x278] sm:$0xff] }
  0x9a   :  { %556 = vmatpush1.msra.mxu0 %v403_v4  ;;  %645 = vmatpush1.msra.mxu1 %v405_v5  ;;  %v475_v4 = vld [vmem:[#allocation8 + $0x260] sm:$0xff]  ;;  %v477_v5 = vld [vmem:[#allocation8 + $0x270] sm:$0xff] }
  0x9b   :  { %557 = vmatprep.subr.mxu0 %v400_v6  ;;  %646 = vmatprep.subr.mxu1 %v402_v7  ;;  %v472_v6 = vld [vmem:[#allocation8 + $0x248] sm:$0xff]  ;;  %v474_v7 = vld [vmem:[#allocation8 + $0x258] sm:$0xff] }
  0x9c   :  { %558 = vmatpush1.msra.mxu0 %v399_v9  ;;  %647 = vmatpush1.msra.mxu1 %v401_v10  ;;  %v471_v9 = vld [vmem:[#allocation8 + $0x240] sm:$0xff]  ;;  %v473_v10 = vld [vmem:[#allocation8 + $0x250] sm:$0xff] }
  0x9d   :  { %559 = vmatprep.subr.mxu0 %v524_v12  ;;  %648 = vmatprep.subr.mxu1 %v526_v13  ;;  %v468_v12 = vld [vmem:[#allocation8 + $0x228] sm:$0xff]  ;;  %v470_v13 = vld [vmem:[#allocation8 + $0x238] sm:$0xff] }
  0x9e   :  { %560 = vmatpush2.msra.mxu0 %v523_v14  ;;  %649 = vmatpush2.msra.mxu1 %v525_v15  ;;  %v467_v14 = vld [vmem:[#allocation8 + $0x220] sm:$0xff]  ;;  %v469_v15 = vld [vmem:[#allocation8 + $0x230] sm:$0xff] }
  0x9f   :  { %561 = vmatprep.subr.mxu0 %v520_v16  ;;  %650 = vmatprep.subr.mxu1 %v522_v17  ;;  %v464_v16 = vld [vmem:[#allocation8 + $0x208] sm:$0xff]  ;;  %v466_v17 = vld [vmem:[#allocation8 + $0x218] sm:$0xff] }
  0xa0   :  { %562 = vmatpush2.msra.mxu0 %v519_v19  ;;  %651 = vmatpush2.msra.mxu1 %v521_v20  ;;  %v463_v19 = vld [vmem:[#allocation8 + $0x200] sm:$0xff]  ;;  %v465_v20 = vld [vmem:[#allocation8 + $0x210] sm:$0xff] }
  0xa1   :  { %563 = vmatprep.subr.mxu0 %v516_v22  ;;  %652 = vmatprep.subr.mxu1 %v518_v23  ;;  %v872_v22 = vld [vmem:[#allocation9 + $0xf8] sm:$0xff] }
  0xa2   :  { %564 = vmatpush2.msra.mxu0 %v515_v24  ;;  %653 = vmatpush2.msra.mxu1 %v517_v25  ;;  %v936_v23 = vld [vmem:[#allocation9 + $0x2f8] sm:$0xff]  ;;  %v935_v24 = vld [vmem:[#allocation9 + $0x2f0] sm:$0xff]  ;;  %v934_v25 = vld [vmem:[#allocation9 + $0x2e8] sm:$0xff] }
  0xa3   :  { %565 = vmatprep.subr.mxu0 %v512_v26  ;;  %654 = vmatprep.subr.mxu1 %v514_v27  ;;  %v932_v26 = vld [vmem:[#allocation9 + $0x2d8] sm:$0xff]  ;;  %v867_v27 = vld [vmem:[#allocation9 + $0xd0] sm:$0xff] }
  0xa4   :  { %566 = vmatpush2.msra.mxu0 %v511_v29  ;;  %655 = vmatpush2.msra.mxu1 %v513_v30  ;;  %v931_v29 = vld [vmem:[#allocation9 + $0x2d0] sm:$0xff]  ;;  %v866_v30 = vld [vmem:[#allocation9 + $0xc8] sm:$0xff] }
  0xa5   :  { %567 = vmatprep.subr.mxu0 %v508_v32  ;;  %656 = vmatprep.subr.mxu1 %v510_v33  ;;  %v865_v32 = vld [vmem:[#allocation9 + $0xc0] sm:$0xff] }
  0xa6   :  { %568 = vmatpush2.msra.mxu0 %v507_v34  ;;  %657 = vmatpush2.msra.mxu1 %v509_v35  ;;  %v929_v33 = vld [vmem:[#allocation9 + $0x2c0] sm:$0xff]  ;;  %v928_v34 = vld [vmem:[#allocation9 + $0x2b8] sm:$0xff]  ;;  %v863_v35 = vld [vmem:[#allocation9 + $0xb0] sm:$0xff] }
  0xa7   :  { %569 = vmatprep.subr.mxu0 %v504_v36  ;;  %658 = vmatprep.subr.mxu1 %v506_v37  ;;  %v927_v36 = vld [vmem:[#allocation9 + $0x2b0] sm:$0xff]  ;;  %v926_v37 = vld [vmem:[#allocation9 + $0x2a8] sm:$0xff] }
  0xa8   :  { %570 = vmatpush2.msra.mxu0 %v503_v38  ;;  %659 = vmatpush2.msra.mxu1 %v505_v39  ;;  %v861_v38 = vld [vmem:[#allocation9 + $0xa0] sm:$0xff] }
  0xa9   :  { %571 = vmatprep.subr.mxu0 %v500_v40  ;;  %660 = vmatprep.subr.mxu1 %v502_v41  ;;  %v925_v39 = vld [vmem:[#allocation9 + $0x2a0] sm:$0xff]  ;;  %v860_v40 = vld [vmem:[#allocation9 + $0x98] sm:$0xff] }
  0xaa   :  { %572 = vmatpush2.msra.mxu0 %v499_v42  ;;  %661 = vmatpush2.msra.mxu1 %v501_v43  ;;  %v924_v41 = vld [vmem:[#allocation9 + $0x298] sm:$0xff]  ;;  %v859_v42 = vld [vmem:[#allocation9 + $0x90] sm:$0xff] }
  0xab   :  { %573 = vmatprep.subr.mxu0 %v496_v44  ;;  %662 = vmatprep.subr.mxu1 %v498_v45  ;;  %v923_v43 = vld [vmem:[#allocation9 + $0x290] sm:$0xff]  ;;  %v858_v44 = vld [vmem:[#allocation9 + $0x88] sm:$0xff] }
  0xac   :  { %574 = vmatpush2.msra.mxu0 %v495_v46  ;;  %663 = vmatpush2.msra.mxu1 %v497_v47  ;;  %v922_v45 = vld [vmem:[#allocation9 + $0x288] sm:$0xff]  ;;  %v857_v46 = vld [vmem:[#allocation9 + $0x80] sm:$0xff] }
  0xad   :  { %575 = vmatprep.subr.mxu0 %v492_v48  ;;  %664 = vmatprep.subr.mxu1 %v494_v49  ;;  %v921_v47 = vld [vmem:[#allocation9 + $0x280] sm:$0xff]  ;;  %v856_v48 = vld [vmem:[#allocation9 + $0x78] sm:$0xff] }
  0xae   :  { %576 = vmatpush2.msra.mxu0 %v491_v50  ;;  %665 = vmatpush2.msra.mxu1 %v493_v51  ;;  %v920_v49 = vld [vmem:[#allocation9 + $0x278] sm:$0xff]  ;;  %v855_v50 = vld [vmem:[#allocation9 + $0x70] sm:$0xff] }
  0xaf   :  { %577 = vmatprep.subr.mxu0 %v488_v52  ;;  %666 = vmatprep.subr.mxu1 %v490_v53  ;;  %v919_v51 = vld [vmem:[#allocation9 + $0x270] sm:$0xff]  ;;  %v854_v52 = vld [vmem:[#allocation9 + $0x68] sm:$0xff] }
  0xb0   :  { %578 = vmatpush2.msra.mxu0 %v487_v54  ;;  %667 = vmatpush2.msra.mxu1 %v489_v55  ;;  %v918_v53 = vld [vmem:[#allocation9 + $0x268] sm:$0xff]  ;;  %v853_v54 = vld [vmem:[#allocation9 + $0x60] sm:$0xff] }
  0xb1   :  { %579 = vmatprep.subr.mxu0 %v484_v56  ;;  %668 = vmatprep.subr.mxu1 %v486_v57  ;;  %v917_v55 = vld [vmem:[#allocation9 + $0x260] sm:$0xff]  ;;  %v852_v56 = vld [vmem:[#allocation9 + $0x58] sm:$0xff] }
  0xb2   :  { %580 = vmatpush2.msra.mxu0 %v483_v58  ;;  %669 = vmatpush2.msra.mxu1 %v485_v59  ;;  %v916_v57 = vld [vmem:[#allocation9 + $0x258] sm:$0xff]  ;;  %v851_v58 = vld [vmem:[#allocation9 + $0x50] sm:$0xff] }
  0xb3   :  { %581 = vmatprep.subr.mxu0 %v480_v60  ;;  %670 = vmatprep.subr.mxu1 %v482_v61  ;;  %v915_v59 = vld [vmem:[#allocation9 + $0x250] sm:$0xff]  ;;  %v850_v60 = vld [vmem:[#allocation9 + $0x48] sm:$0xff] }
  0xb4   :  { %582 = vmatpush2.msra.mxu0 %v479_v62  ;;  %671 = vmatpush2.msra.mxu1 %v481_v0  ;;  %v914_v61 = vld [vmem:[#allocation9 + $0x248] sm:$0xff]  ;;  %v849_v62 = vld [vmem:[#allocation9 + $0x40] sm:$0xff] }
  0xb5   :  { %583 = vmatprep.subr.mxu0 %v476_v2  ;;  %672 = vmatprep.subr.mxu1 %v478_v3  ;;  %v913_v0 = vld [vmem:[#allocation9 + $0x240] sm:$0xff]  ;;  %v848_v2 = vld [vmem:[#allocation9 + $0x38] sm:$0xff] }
  0xb6   :  { %584 = vmatpush2.msra.mxu0 %v475_v4  ;;  %673 = vmatpush2.msra.mxu1 %v477_v5  ;;  %v912_v3 = vld [vmem:[#allocation9 + $0x238] sm:$0xff]  ;;  %v847_v4 = vld [vmem:[#allocation9 + $0x30] sm:$0xff] }
  0xb7   :  { %585 = vmatprep.subr.mxu0 %v472_v6  ;;  %674 = vmatprep.subr.mxu1 %v474_v7  ;;  %v911_v5 = vld [vmem:[#allocation9 + $0x230] sm:$0xff]  ;;  %v846_v6 = vld [vmem:[#allocation9 + $0x28] sm:$0xff] }
  0xb8   :  { %586 = vmatpush2.msra.mxu0 %v471_v9  ;;  %675 = vmatpush2.msra.mxu1 %v473_v10  ;;  %v910_v7 = vld [vmem:[#allocation9 + $0x228] sm:$0xff]  ;;  %v845_v9 = vld [vmem:[#allocation9 + $0x20] sm:$0xff] }
  0xb9   :  { %587 = vmatprep.subr.mxu0 %v468_v12  ;;  %676 = vmatprep.subr.mxu1 %v470_v13  ;;  %v909_v10 = vld [vmem:[#allocation9 + $0x220] sm:$0xff]  ;;  %v844_v12 = vld [vmem:[#allocation9 + $0x18] sm:$0xff] }
  0xba   :  { %588 = vmatpush2.msra.mxu0 %v467_v14  ;;  %677 = vmatpush2.msra.mxu1 %v469_v15  ;;  %v908_v13 = vld [vmem:[#allocation9 + $0x218] sm:$0xff]  ;;  %v843_v14 = vld [vmem:[#allocation9 + $0x10] sm:$0xff] }
  0xbb   :  { %589 = vmatprep.subr.mxu0 %v464_v16  ;;  %678 = vmatprep.subr.mxu1 %v466_v17  ;;  %v907_v15 = vld [vmem:[#allocation9 + $0x210] sm:$0xff]  ;;  %v842_v16 = vld [vmem:[#allocation9 + $0x8] sm:$0xff] }
  0xbc   :  { %590 = vmatpush2.msra.mxu0 %v463_v19  ;;  %591 = vmatprep.mubr.f32.mxu0 %v1456_v63  ;;  %v906_v17 = vld [vmem:[#allocation9 + $0x208] sm:$0xff]  ;;  %v841_v19 = vld [vmem:[#allocation9] sm:$0xff] }
  0xbd   :  { %679 = vmatpush2.msra.mxu1 %v465_v20  ;;  %680 = vmatprep.mubr.f32.mxu1 %v1456_v63  ;;  %v871_v63 = vld [vmem:[#allocation9 + $0xf0] sm:$0xff]  ;;  %v905_v20 = vld [vmem:[#allocation9 + $0x200] sm:$0xff] }
  0xbe   :  { %592 = vmatmul.mubr.f32.vlgmr.msra.gmra.mxu0 %v1458_v1  ;;  %681 = vmatmul.mubr.f32.vlgmr.msra.gmra.mxu1 %v1458_v1  ;;  %v870_v1 = vld [vmem:[#allocation9 + $0xe8] sm:$0xff] }
  0xbf   :  { %597 = vmatprep.mubr.f32.mxu0 %v1464_v8  ;;  %686 = vmatprep.mubr.f32.mxu1 %v1464_v8  ;;  %v869_v8 = vld [vmem:[#allocation9 + $0xe0] sm:$0xff] }
  0xc0   :  { %969 = vmatprep.subr.mxu0 %v872_v22  ;;  %1058 = vmatprep.subr.mxu1 %v936_v23  ;;  %v904_v22 = vld [vmem:[#allocation9 + $0x1f8] sm:$0xff] }
  0xc1   :  { %970 = vmatpush1.msra.mxu0 %v871_v63  ;;  %1059 = vmatpush1.msra.mxu1 %v935_v24  ;;  %v968_v23 = vld [vmem:[#allocation9 + $0x3f8] sm:$0xff]  ;;  %v903_v63 = vld [vmem:[#allocation9 + $0x1f0] sm:$0xff] }
  0xc2   :  { %598 = vmatmul.mubr.f32.gmra.mxu0 %v1466_v11  ;;  %687 = vmatmul.mubr.f32.gmra.mxu1 %v1466_v11  ;;  %v933_v11 = vld [vmem:[#allocation9 + $0x2e0] sm:$0xff]  ;;  %v967_v24 = vld [vmem:[#allocation9 + $0x3f0] sm:$0xff] }
  0xc3   :  { %603 = vmatprep.mubr.f32.mxu0 %v1472_v18  ;;  %692 = vmatprep.mubr.f32.mxu1 %v1472_v18  ;;  %v868_v18 = vld [vmem:[#allocation9 + $0xd8] sm:$0xff] }
  0xc4   :  { %971 = vmatprep.subr.mxu0 %v870_v1  ;;  %1060 = vmatprep.subr.mxu1 %v934_v25  ;;  %v902_v1 = vld [vmem:[#allocation9 + $0x1e8] sm:$0xff] }
  0xc5   :  { %972 = vmatpush1.msra.mxu0 %v869_v8  ;;  %1061 = vmatpush1.msra.mxu1 %v933_v11  ;;  %v966_v25 = vld [vmem:[#allocation9 + $0x3e8] sm:$0xff]  ;;  %v901_v8 = vld [vmem:[#allocation9 + $0x1e0] sm:$0xff] }
  0xc6   :  { %604 = vmatmul.mubr.f32.gmra.mxu0 %v1474_v21  ;;  %693 = vmatmul.mubr.f32.gmra.mxu1 %v1474_v21  ;;  %v930_v21 = vld [vmem:[#allocation9 + $0x2c8] sm:$0xff]  ;;  %v965_v11 = vld [vmem:[#allocation9 + $0x3e0] sm:$0xff] }
  0xc7   :  { %609 = vmatprep.mubr.f32.mxu0 %v1480_v28  ;;  %698 = vmatprep.mubr.f32.mxu1 %v1480_v28  ;;  %v864_v28 = vld [vmem:[#allocation9 + $0xb8] sm:$0xff] }
  0xc8   :  { %973 = vmatprep.subr.mxu0 %v868_v18  ;;  %1062 = vmatprep.subr.mxu1 %v932_v26  ;;  %v900_v18 = vld [vmem:[#allocation9 + $0x1d8] sm:$0xff] }
  0xc9   :  { %974 = vmatpush1.msra.mxu0 %v867_v27  ;;  %1063 = vmatpush1.msra.mxu1 %v931_v29  ;;  %v964_v26 = vld [vmem:[#allocation9 + $0x3d8] sm:$0xff]  ;;  %v899_v27 = vld [vmem:[#allocation9 + $0x1d0] sm:$0xff] }
  0xca   :  { %610 = vmatmul.mubr.f32.gmra.mxu0 %v1482_v31  ;;  %699 = vmatmul.mubr.f32.gmra.mxu1 %v1482_v31  ;;  %v862_v31 = vld [vmem:[#allocation9 + $0xa8] sm:$0xff]  ;;  %v963_v29 = vld [vmem:[#allocation9 + $0x3d0] sm:$0xff] }
  0xcb   :  { %975 = vmatprep.subr.mxu0 %v866_v30  ;;  %1064 = vmatprep.subr.mxu1 %v930_v21  ;;  %v898_v30 = vld [vmem:[#allocation9 + $0x1c8] sm:$0xff] }
  0xcc   :  { %976 = vmatpush1.msra.mxu0 %v865_v32  ;;  %1065 = vmatpush1.msra.mxu1 %v929_v33  ;;  %v962_v21 = vld [vmem:[#allocation9 + $0x3c8] sm:$0xff]  ;;  %v897_v32 = vld [vmem:[#allocation9 + $0x1c0] sm:$0xff] }
  0xcd   :  { %977 = vmatprep.subr.mxu0 %v864_v28  ;;  %1066 = vmatprep.subr.mxu1 %v928_v34  ;;  %v961_v33 = vld [vmem:[#allocation9 + $0x3c0] sm:$0xff]  ;;  %v896_v28 = vld [vmem:[#allocation9 + $0x1b8] sm:$0xff] }
  0xce   :  { %978 = vmatpush1.msra.mxu0 %v863_v35  ;;  %1067 = vmatpush1.msra.mxu1 %v927_v36  ;;  %v960_v34 = vld [vmem:[#allocation9 + $0x3b8] sm:$0xff]  ;;  %v895_v35 = vld [vmem:[#allocation9 + $0x1b0] sm:$0xff] }
  0xcf   :  { %979 = vmatprep.subr.mxu0 %v862_v31  ;;  %1068 = vmatprep.subr.mxu1 %v926_v37  ;;  %v959_v36 = vld [vmem:[#allocation9 + $0x3b0] sm:$0xff]  ;;  %v894_v31 = vld [vmem:[#allocation9 + $0x1a8] sm:$0xff] }
  0xd0   :  { %980 = vmatpush1.msra.mxu0 %v861_v38  ;;  %1069 = vmatpush1.msra.mxu1 %v925_v39  ;;  %v958_v37 = vld [vmem:[#allocation9 + $0x3a8] sm:$0xff]  ;;  %v893_v38 = vld [vmem:[#allocation9 + $0x1a0] sm:$0xff] }
  0xd1   :  { %981 = vmatprep.subr.mxu0 %v860_v40  ;;  %1070 = vmatprep.subr.mxu1 %v924_v41  ;;  %v957_v39 = vld [vmem:[#allocation9 + $0x3a0] sm:$0xff]  ;;  %v892_v40 = vld [vmem:[#allocation9 + $0x198] sm:$0xff] }
  0xd2   :  { %982 = vmatpush1.msra.mxu0 %v859_v42  ;;  %1071 = vmatpush1.msra.mxu1 %v923_v43  ;;  %v956_v41 = vld [vmem:[#allocation9 + $0x398] sm:$0xff]  ;;  %v891_v42 = vld [vmem:[#allocation9 + $0x190] sm:$0xff] }
  0xd3   :  { %983 = vmatprep.subr.mxu0 %v858_v44  ;;  %1072 = vmatprep.subr.mxu1 %v922_v45  ;;  %v955_v43 = vld [vmem:[#allocation9 + $0x390] sm:$0xff]  ;;  %v890_v44 = vld [vmem:[#allocation9 + $0x188] sm:$0xff] }
  0xd4   :  { %984 = vmatpush1.msra.mxu0 %v857_v46  ;;  %1073 = vmatpush1.msra.mxu1 %v921_v47  ;;  %v954_v45 = vld [vmem:[#allocation9 + $0x388] sm:$0xff]  ;;  %v889_v46 = vld [vmem:[#allocation9 + $0x180] sm:$0xff] }
  0xd5   :  { %985 = vmatprep.subr.mxu0 %v856_v48  ;;  %1074 = vmatprep.subr.mxu1 %v920_v49  ;;  %v953_v47 = vld [vmem:[#allocation9 + $0x380] sm:$0xff]  ;;  %v888_v48 = vld [vmem:[#allocation9 + $0x178] sm:$0xff] }
  0xd6   :  { %986 = vmatpush1.msra.mxu0 %v855_v50  ;;  %1075 = vmatpush1.msra.mxu1 %v919_v51  ;;  %v952_v49 = vld [vmem:[#allocation9 + $0x378] sm:$0xff]  ;;  %v887_v50 = vld [vmem:[#allocation9 + $0x170] sm:$0xff] }
  0xd7   :  { %987 = vmatprep.subr.mxu0 %v854_v52  ;;  %1076 = vmatprep.subr.mxu1 %v918_v53  ;;  %v951_v51 = vld [vmem:[#allocation9 + $0x370] sm:$0xff]  ;;  %v886_v52 = vld [vmem:[#allocation9 + $0x168] sm:$0xff] }
  0xd8   :  { %988 = vmatpush1.msra.mxu0 %v853_v54  ;;  %1077 = vmatpush1.msra.mxu1 %v917_v55  ;;  %v950_v53 = vld [vmem:[#allocation9 + $0x368] sm:$0xff]  ;;  %v885_v54 = vld [vmem:[#allocation9 + $0x160] sm:$0xff] }
  0xd9   :  { %989 = vmatprep.subr.mxu0 %v852_v56  ;;  %1078 = vmatprep.subr.mxu1 %v916_v57  ;;  %v949_v55 = vld [vmem:[#allocation9 + $0x360] sm:$0xff]  ;;  %v884_v56 = vld [vmem:[#allocation9 + $0x158] sm:$0xff] }
  0xda   :  { %990 = vmatpush1.msra.mxu0 %v851_v58  ;;  %1079 = vmatpush1.msra.mxu1 %v915_v59  ;;  %v948_v57 = vld [vmem:[#allocation9 + $0x358] sm:$0xff]  ;;  %v883_v58 = vld [vmem:[#allocation9 + $0x150] sm:$0xff] }
  0xdb   :  { %991 = vmatprep.subr.mxu0 %v850_v60  ;;  %1080 = vmatprep.subr.mxu1 %v914_v61  ;;  %v947_v59 = vld [vmem:[#allocation9 + $0x350] sm:$0xff]  ;;  %v882_v60 = vld [vmem:[#allocation9 + $0x148] sm:$0xff] }
  0xdc   :  { %992 = vmatpush1.msra.mxu0 %v849_v62  ;;  %1081 = vmatpush1.msra.mxu1 %v913_v0  ;;  %v946_v61 = vld [vmem:[#allocation9 + $0x348] sm:$0xff]  ;;  %v881_v62 = vld [vmem:[#allocation9 + $0x140] sm:$0xff] }
  0xdd   :  { %993 = vmatprep.subr.mxu0 %v848_v2  ;;  %1082 = vmatprep.subr.mxu1 %v912_v3  ;;  %v945_v0 = vld [vmem:[#allocation9 + $0x340] sm:$0xff]  ;;  %v880_v2 = vld [vmem:[#allocation9 + $0x138] sm:$0xff] }
  0xde   :  { %994 = vmatpush1.msra.mxu0 %v847_v4  ;;  %1083 = vmatpush1.msra.mxu1 %v911_v5  ;;  %v944_v3 = vld [vmem:[#allocation9 + $0x338] sm:$0xff]  ;;  %v879_v4 = vld [vmem:[#allocation9 + $0x130] sm:$0xff] }
  0xdf   :  { %995 = vmatprep.subr.mxu0 %v846_v6  ;;  %1084 = vmatprep.subr.mxu1 %v910_v7  ;;  %v943_v5 = vld [vmem:[#allocation9 + $0x330] sm:$0xff]  ;;  %v878_v6 = vld [vmem:[#allocation9 + $0x128] sm:$0xff] }
  0xe0   :  { %996 = vmatpush1.msra.mxu0 %v845_v9  ;;  %1085 = vmatpush1.msra.mxu1 %v909_v10  ;;  %v942_v7 = vld [vmem:[#allocation9 + $0x328] sm:$0xff]  ;;  %v877_v9 = vld [vmem:[#allocation9 + $0x120] sm:$0xff] }
  0xe1   :  { %997 = vmatprep.subr.mxu0 %v844_v12  ;;  %1086 = vmatprep.subr.mxu1 %v908_v13  ;;  %v941_v10 = vld [vmem:[#allocation9 + $0x320] sm:$0xff]  ;;  %v876_v12 = vld [vmem:[#allocation9 + $0x118] sm:$0xff] }
  0xe2   :  { %998 = vmatpush1.msra.mxu0 %v843_v14  ;;  %1087 = vmatpush1.msra.mxu1 %v907_v15  ;;  %v940_v13 = vld [vmem:[#allocation9 + $0x318] sm:$0xff]  ;;  %v875_v14 = vld [vmem:[#allocation9 + $0x110] sm:$0xff] }
  0xe3   :  { %999 = vmatprep.subr.mxu0 %v842_v16  ;;  %1088 = vmatprep.subr.mxu1 %v906_v17  ;;  %v939_v15 = vld [vmem:[#allocation9 + $0x310] sm:$0xff]  ;;  %v874_v16 = vld [vmem:[#allocation9 + $0x108] sm:$0xff] }
  0xe4   :  { %1000 = vmatpush1.msra.mxu0 %v841_v19  ;;  %1089 = vmatpush1.msra.mxu1 %v905_v20  ;;  %v938_v17 = vld [vmem:[#allocation9 + $0x308] sm:$0xff]  ;;  %v873_v19 = vld [vmem:[#allocation9 + $0x100] sm:$0xff] }
  0xe5   :  { %1001 = vmatprep.subr.mxu0 %v904_v22  ;;  %1090 = vmatprep.subr.mxu1 %v968_v23  ;;  %v937_v20 = vld [vmem:[#allocation9 + $0x300] sm:$0xff] }
  0xe6   :  { %1002 = vmatpush2.msra.mxu0 %v903_v63  ;;  %1091 = vmatpush2.msra.mxu1 %v967_v24 }
  0xe7   :  { %1003 = vmatprep.subr.mxu0 %v902_v1  ;;  %1092 = vmatprep.subr.mxu1 %v966_v25 }
  0xe8   :  { %1004 = vmatpush2.msra.mxu0 %v901_v8  ;;  %1093 = vmatpush2.msra.mxu1 %v965_v11 }
  0xe9   :  { %1005 = vmatprep.subr.mxu0 %v900_v18  ;;  %1094 = vmatprep.subr.mxu1 %v964_v26 }
  0xea   :  { %1006 = vmatpush2.msra.mxu0 %v899_v27  ;;  %1095 = vmatpush2.msra.mxu1 %v963_v29 }
  0xeb   :  { %1007 = vmatprep.subr.mxu0 %v898_v30  ;;  %1096 = vmatprep.subr.mxu1 %v962_v21 }
  0xec   :  { %1008 = vmatpush2.msra.mxu0 %v897_v32  ;;  %1097 = vmatpush2.msra.mxu1 %v961_v33 }
  0xed   :  { %1009 = vmatprep.subr.mxu0 %v896_v28  ;;  %1098 = vmatprep.subr.mxu1 %v960_v34 }
  0xee   :  { %1010 = vmatpush2.msra.mxu0 %v895_v35  ;;  %1099 = vmatpush2.msra.mxu1 %v959_v36 }
  0xef   :  { %1011 = vmatprep.subr.mxu0 %v894_v31  ;;  %1100 = vmatprep.subr.mxu1 %v958_v37 }
  0xf0   :  { %1012 = vmatpush2.msra.mxu0 %v893_v38  ;;  %1101 = vmatpush2.msra.mxu1 %v957_v39 }
  0xf1   :  { %1013 = vmatprep.subr.mxu0 %v892_v40  ;;  %1102 = vmatprep.subr.mxu1 %v956_v41 }
  0xf2   :  { %1014 = vmatpush2.msra.mxu0 %v891_v42  ;;  %1103 = vmatpush2.msra.mxu1 %v955_v43 }
  0xf3   :  { %1015 = vmatprep.subr.mxu0 %v890_v44  ;;  %1104 = vmatprep.subr.mxu1 %v954_v45 }
  0xf4   :  { %1016 = vmatpush2.msra.mxu0 %v889_v46  ;;  %1105 = vmatpush2.msra.mxu1 %v953_v47 }
  0xf5   :  { %1017 = vmatprep.subr.mxu0 %v888_v48  ;;  %1106 = vmatprep.subr.mxu1 %v952_v49 }
  0xf6   :  { %1018 = vmatpush2.msra.mxu0 %v887_v50  ;;  %1107 = vmatpush2.msra.mxu1 %v951_v51 }
  0xf7   :  { %1019 = vmatprep.subr.mxu0 %v886_v52  ;;  %1108 = vmatprep.subr.mxu1 %v950_v53 }
  0xf8   :  { %1020 = vmatpush2.msra.mxu0 %v885_v54  ;;  %1109 = vmatpush2.msra.mxu1 %v949_v55 }
  0xf9   :  { %1021 = vmatprep.subr.mxu0 %v884_v56  ;;  %1110 = vmatprep.subr.mxu1 %v948_v57 }
  0xfa   :  { %1022 = vmatpush2.msra.mxu0 %v883_v58  ;;  %1111 = vmatpush2.msra.mxu1 %v947_v59 }
  0xfb   :  { %1023 = vmatprep.subr.mxu0 %v882_v60  ;;  %1112 = vmatprep.subr.mxu1 %v946_v61 }
  0xfc   :  { %1024 = vmatpush2.msra.mxu0 %v881_v62  ;;  %1113 = vmatpush2.msra.mxu1 %v945_v0 }
  0xfd   :  { %1025 = vmatprep.subr.mxu0 %v880_v2  ;;  %1114 = vmatprep.subr.mxu1 %v944_v3 }
  0xfe   :  { %1026 = vmatpush2.msra.mxu0 %v879_v4  ;;  %1115 = vmatpush2.msra.mxu1 %v943_v5 }
  0xff   :  { %1027 = vmatprep.subr.mxu0 %v878_v6  ;;  %1116 = vmatprep.subr.mxu1 %v942_v7 }
 0x100   :  { %1028 = vmatpush2.msra.mxu0 %v877_v9  ;;  %1117 = vmatpush2.msra.mxu1 %v941_v10 }
 0x101   :  { %1029 = vmatprep.subr.mxu0 %v876_v12  ;;  %1118 = vmatprep.subr.mxu1 %v940_v13 }
 0x102   :  { %1030 = vmatpush2.msra.mxu0 %v875_v14  ;;  %1119 = vmatpush2.msra.mxu1 %v939_v15 }
 0x103   :  { %1031 = vmatprep.subr.mxu0 %v874_v16  ;;  %1120 = vmatprep.subr.mxu1 %v938_v17 }
 0x104   :  { %1032 = vmatpush2.msra.mxu0 %v873_v19  ;;  %1121 = vmatpush2.msra.mxu1 %v937_v20 }
 0x136   :  { %v1504_v22 = vpop.f32.mrf.mxu0  ;;  %v1506_v23 = vpop.f32.mrf.mxu1 }
 0x137   :  { %v1201_v27 = vmul.f32 -1.442695, %v1504_v22  ;;  %v1203_v32 = vmul.f32 -1.442695, %v1506_v23 }
 0x138   :  { %v1508_v63 = vpop.f32.mrf.mxu0  ;;  %v1510_v24 = vpop.f32.mrf.mxu1 }
 0x139   :  { %v1202_v29 = vmul.f32 -1.442695, %v1508_v63  ;;  %v1204_v30 = vmul.f32 -1.442695, %v1510_v24  ;;  %1226 = vpow2.f32 %v1201_v27 }
 0x13b   :  { %1228 = vpow2.f32 %v1202_v29 }
 0x13c   :  { %v1512_v1 = vpop.f32.mrf.mxu0  ;;  %v1514_v25 = vpop.f32.mrf.mxu1  ;;  %1230 = vpow2.f32 %v1204_v30 }
 0x13d   :  { %v1205_v28 = vmul.f32 -1.442695, %v1512_v1  ;;  %1232 = vpow2.f32 %v1203_v32  ;;  %v1207_v31 = vmul.f32 -1.442695, %v1514_v25 }
 0x13e   :  { %v1516_v8 = vpop.f32.mrf.mxu0  ;;  %v1518_v11 = vpop.f32.mrf.mxu1 }
 0x13f   :  { %v1206_v34 = vmul.f32 -1.442695, %v1516_v8  ;;  %v1208_v35 = vmul.f32 -1.442695, %v1518_v11  ;;  %1234 = vpow2.f32 %v1205_v28 }
 0x141   :  { %1236 = vpow2.f32 %v1206_v34 }
 0x142   :  { %v1520_v18 = vpop.f32.mrf.mxu0  ;;  %v1522_v26 = vpop.f32.mrf.mxu1  ;;  %1238 = vpow2.f32 %v1208_v35 }
 0x143   :  { %v1209_v38 = vmul.f32 -1.442695, %v1520_v18  ;;  %1240 = vpow2.f32 %v1207_v31  ;;  %v1211_v42 = vmul.f32 -1.442695, %v1522_v26 }
 0x144   :  { %v1527_v21 = vpop.f32.mrf.mxu0  ;;  %v1530_v33 = vpop.f32.mrf.mxu1 }
 0x145   :  { %v1210_v39 = vmul.f32 -1.442695, %v1527_v21  ;;  %v1212_v40 = vmul.f32 -1.442695, %v1530_v33  ;;  %1242 = vpow2.f32 %v1209_v38 }
 0x146   :  { %v1227_v48 = vpop.eup %1226 }
 0x147   :  { %1244 = vpow2.f32 %v1210_v39  ;;  %v753_v52 = vadd.f32 1.0, %v1227_v48 }
 0x148   :  { %v1535_v36 = vpop.f32.mrf.mxu0  ;;  %v1538_v37 = vpop.f32.mrf.mxu1  ;;  %1246 = vpow2.f32 %v1212_v40 }
 0x149   :  { %v1213_v44 = vmul.f32 -1.442695, %v1535_v36  ;;  %1248 = vpow2.f32 %v1211_v42  ;;  %v1215_v47 = vmul.f32 -1.442695, %v1538_v37  ;;  %v1229_v49 = vpop.eup %1228 }
 0x14a   :  { %v1543_v41 = vpop.f32.mrf.mxu0  ;;  %v1546_v43 = vpop.f32.mrf.mxu1  ;;  %v754_v54 = vadd.f32 1.0, %v1229_v49 }
 0x14b   :  { %v1214_v45 = vmul.f32 -1.442695, %v1543_v41  ;;  %v1216_v46 = vmul.f32 -1.442695, %v1546_v43  ;;  %1250 = vpow2.f32 %v1213_v44  ;;  %v1231_v50 = vpop.eup %1230 }
 0x14c   :  { %v1233_v51 = vpop.eup %1232  ;;  %v756_v56 = vadd.f32 1.0, %v1231_v50 }
 0x14d   :  { %1252 = vpow2.f32 %v1214_v45  ;;  %v1235_v53 = vpop.eup %1234  ;;  %v755_v58 = vadd.f32 1.0, %v1233_v51 }
 0x14e   :  { %1254 = vpow2.f32 %v1216_v46  ;;  %v1237_v55 = vpop.eup %1236  ;;  %v757_v60 = vadd.f32 1.0, %v1235_v53 }
 0x14f   :  { %1256 = vpow2.f32 %v1215_v47  ;;  %v1239_v57 = vpop.eup %1238  ;;  %v758_v62 = vadd.f32 1.0, %v1237_v55 }
 0x150   :  { %v1241_v59 = vpop.eup %1240  ;;  %1258 = vrcp.f32 %v753_v52  ;;  %v760_v2 = vadd.f32 1.0, %v1239_v57 }
 0x151   :  { %1260 = vrcp.f32 %v754_v54  ;;  %v759_v4 = vadd.f32 1.0, %v1241_v59 }
 0x152   :  { %v1243_v61 = vpop.eup %1242  ;;  %1262 = vrcp.f32 %v756_v56 }
 0x153   :  { %1264 = vrcp.f32 %v755_v58  ;;  %v761_v6 = vadd.f32 1.0, %v1243_v61 }
 0x154   :  { %v1245_v0 = vpop.eup %1244  ;;  %1266 = vrcp.f32 %v757_v60 }
 0x155   :  { %v1247_v3 = vpop.eup %1246  ;;  %1268 = vrcp.f32 %v758_v62  ;;  %v762_v9 = vadd.f32 1.0, %v1245_v0 }
 0x156   :  { %v1249_v5 = vpop.eup %1248  ;;  %1270 = vrcp.f32 %v760_v2  ;;  %v764_v12 = vadd.f32 1.0, %v1247_v3 }
 0x157   :  { %1272 = vrcp.f32 %v759_v4  ;;  %v763_v14 = vadd.f32 1.0, %v1249_v5 }
 0x158   :  { %v1251_v7 = vpop.eup %1250  ;;  %1274 = vrcp.f32 %v761_v6 }
 0x159   :  { %v765_v16 = vadd.f32 1.0, %v1251_v7  ;;  %1276 = vrcp.f32 %v762_v9 }
 0x15a   :  { %v1253_v10 = vpop.eup %1252  ;;  %1278 = vrcp.f32 %v764_v12 }
 0x15b   :  { %v1255_v13 = vpop.eup %1254  ;;  %v766_v17 = vadd.f32 1.0, %v1253_v10  ;;  %1280 = vrcp.f32 %v763_v14 }
 0x15c   :  { %v1257_v15 = vpop.eup %1256  ;;  %v768_v19 = vadd.f32 1.0, %v1255_v13  ;;  %1282 = vrcp.f32 %v765_v16 }
 0x15d   :  { %v767_v20 = vadd.f32 1.0, %v1257_v15  ;;  %v1259_v27 = vpop.eup %1258  ;;  %1284 = vrcp.f32 %v766_v17 }
 0x15e   :  { %v1261_v29 = vpop.eup %1260  ;;  %1286 = vrcp.f32 %v768_v19  ;;  %v801_v42 = vmul.f32 %v1259_v27, %v1504_v22 }
 0x15f   :  { %v1263_v30 = vpop.eup %1262  ;;  %1288 = vrcp.f32 %v767_v20  ;;  %v802_v38 = vmul.f32 %v1261_v29, %v1508_v63 }
 0x160   :  { %v1265_v32 = vpop.eup %1264  ;;  %v804_v39 = vmul.f32 %v1263_v30, %v1510_v24 }
 0x161   :  { %v1267_v28 = vpop.eup %1266  ;;  %v803_v44 = vmul.f32 %v1265_v32, %v1506_v23 }
 0x162   :  { %v1269_v31 = vpop.eup %1268  ;;  %v805_v23 = vmul.f32 %v1267_v28, %v1512_v1 }
 0x163   :  { %v1271_v40 = vpop.eup %1270  ;;  %v806_v63 = vmul.f32 %v1269_v31, %v1516_v8 }
 0x164   :  { %v1273_v47 = vpop.eup %1272  ;;  %v808_v24 = vmul.f32 %v1271_v40, %v1518_v11 }
 0x165   :  { %v1275_v50 = vpop.eup %1274  ;;  %v807_v56 = vmul.f32 %v1273_v47, %v1514_v25 }
 0x166   :  { %v1277_v55 = vpop.eup %1276  ;;  %v809_v25 = vmul.f32 %v1275_v50, %v1520_v18 }
 0x167   :  { %v1279_v22 = vpop.eup %1278  ;;  %v810_v4 = vmul.f32 %v1277_v55, %v1527_v21 }
 0x168   :  { %v1281_v59 = vpop.eup %1280  ;;  %v812_v5 = vmul.f32 %v1279_v22, %v1530_v33 }
 0x169   :  { %v1283_v62 = vpop.eup %1282  ;;  %v811_v6 = vmul.f32 %v1281_v59, %v1522_v26 }
 0x16a   :  { %v1285_v11 = vpop.eup %1284  ;;  %v813_v18 = vmul.f32 %v1283_v62, %v1535_v36 }
 0x16b   :  { %v1287_v1 = vpop.eup %1286  ;;  %v814_v33 = vmul.f32 %v1285_v11, %v1543_v41 }
 0x16c   :  { %v1289_v10 = vpop.eup %1288  ;;  %v816_v17 = vmul.f32 %v1287_v1, %v1546_v43 }
 0x16d   :  { %v815_v26 = vmul.f32 %v1289_v10, %v1538_v37 }
 0x17e   :  { %v593_v34 = vpop.f32.mrf.mxu0  ;;  %v682_v35 = vpop.f32.mrf.mxu1 }
 0x17f   :  { %v817_v51 = vmul.f32 %v801_v42, %v593_v34  ;;  %v819_v52 = vmul.f32 %v803_v44, %v682_v35 }
 0x180   :  { %v595_v45 = vpop.f32.mrf.mxu0  ;;  %v684_v46 = vpop.f32.mrf.mxu1 }
 0x181   :  { %v818_v48 = vmul.f32 %v802_v38, %v595_v45  ;;  %v820_v49 = vmul.f32 %v804_v39, %v684_v46 }
 0x182   :  { %v599_v53 = vpop.f32.mrf.mxu0  ;;  %v688_v54 = vpop.f32.mrf.mxu1 }
 0x183   :  { %1033 = vmatprep.mubr.f32.mxu0 %v818_v48  ;;  %1122 = vmatprep.mubr.f32.mxu1 %v820_v49  ;;  %v821_v0 = vmul.f32 %v805_v23, %v599_v53  ;;  %v823_v2 = vmul.f32 %v807_v56, %v688_v54 }
 0x184   :  { %v601_v57 = vpop.f32.mrf.mxu0  ;;  %v690_v58 = vpop.f32.mrf.mxu1  ;;  %1034 = vmatmul.mubr.f32.vlgmr.msra.gmra.mxu0 %v817_v51  ;;  %1123 = vmatmul.mubr.f32.vlgmr.msra.gmra.mxu1 %v819_v52 }
 0x185   :  { %v822_v60 = vmul.f32 %v806_v63, %v601_v57  ;;  %v824_v61 = vmul.f32 %v808_v24, %v690_v58 }
 0x186   :  { %v605_v8 = vpop.f32.mrf.mxu0  ;;  %v694_v3 = vpop.f32.mrf.mxu1 }
 0x187   :  { %1039 = vmatprep.mubr.f32.mxu0 %v822_v60  ;;  %1128 = vmatprep.mubr.f32.mxu1 %v824_v61  ;;  %v825_v14 = vmul.f32 %v809_v25, %v605_v8  ;;  %v827_v15 = vmul.f32 %v811_v6, %v694_v3 }
 0x188   :  { %v607_v7 = vpop.f32.mrf.mxu0  ;;  %v696_v9 = vpop.f32.mrf.mxu1  ;;  %1040 = vmatmul.mubr.f32.gmra.mxu0 %v821_v0  ;;  %1129 = vmatmul.mubr.f32.gmra.mxu1 %v823_v2 }
 0x189   :  { %v826_v12 = vmul.f32 %v810_v4, %v607_v7  ;;  %v828_v13 = vmul.f32 %v812_v5, %v696_v9 }
 0x18a   :  { %v611_v16 = vpop.f32.mrf.mxu0  ;;  %v700_v21 = vpop.f32.mrf.mxu1 }
 0x18b   :  { %1045 = vmatprep.mubr.f32.mxu0 %v826_v12  ;;  %1134 = vmatprep.mubr.f32.mxu1 %v828_v13  ;;  %v829_v30 = vmul.f32 %v813_v18, %v611_v16  ;;  %v831_v32 = vmul.f32 %v815_v26, %v700_v21 }
 0x18c   :  { %v613_v19 = vpop.f32.mrf.mxu0  ;;  %v702_v20 = vpop.f32.mrf.mxu1  ;;  %1046 = vmatmul.mubr.f32.gmra.mxu0 %v825_v14  ;;  %1135 = vmatmul.mubr.f32.gmra.mxu1 %v827_v15 }
 0x18d   :  { %v830_v27 = vmul.f32 %v814_v33, %v613_v19  ;;  %v832_v29 = vmul.f32 %v816_v17, %v702_v20 }
 0x18f   :  { %1051 = vmatprep.mubr.f32.mxu0 %v830_v27  ;;  %1140 = vmatprep.mubr.f32.mxu1 %v832_v29 }
 0x190   :  { %1052 = vmatmul.mubr.f32.gmra.mxu0 %v829_v30  ;;  %1141 = vmatmul.mubr.f32.gmra.mxu1 %v831_v32 }
 0x244   :  { %v1035_v41 = vpop.f32.mrf.mxu0  ;;  %v1124_v43 = vpop.f32.mrf.mxu1 }
 0x245   :  { %v1125_v28 = vadd.f32 %v1124_v43, %v1035_v41 }
 0x246   :  { %v1037_v34 = vpop.f32.mrf.mxu0  ;;  %v1126_v35 = vpop.f32.mrf.mxu1 }
 0x247   :  { %1174 = vst [vmem:[#allocation11] sm:$0xff] %v1125_v28  ;;  %v1127_v36 = vadd.f32 %v1126_v35, %v1037_v34 }
 0x248   :  { %v1041_v37 = vpop.f32.mrf.mxu0  ;;  %v1130_v31 = vpop.f32.mrf.mxu1 }
 0x249   :  { %1175 = vst [vmem:[#allocation11 + $0x8] sm:$0xff] %v1127_v36  ;;  %v1131_v38 = vadd.f32 %v1130_v31, %v1041_v37 }
 0x24a   :  { %v1043_v39 = vpop.f32.mrf.mxu0  ;;  %v1132_v40 = vpop.f32.mrf.mxu1 }
 0x24b   :  { %1176 = vst [vmem:[#allocation11 + $0x10] sm:$0xff] %v1131_v38  ;;  %v1133_v42 = vadd.f32 %v1132_v40, %v1043_v39 }
 0x24c   :  { %v1047_v44 = vpop.f32.mrf.mxu0  ;;  %v1136_v45 = vpop.f32.mrf.mxu1 }
 0x24d   :  { %1177 = vst [vmem:[#allocation11 + $0x18] sm:$0xff] %v1133_v42  ;;  %v1137_v46 = vadd.f32 %v1136_v45, %v1047_v44 }
 0x24e   :  { %v1049_v47 = vpop.f32.mrf.mxu0  ;;  %v1138_v48 = vpop.f32.mrf.mxu1 }
 0x24f   :  { %1178 = vst [vmem:[#allocation11 + $0x20] sm:$0xff] %v1137_v46  ;;  %v1139_v49 = vadd.f32 %v1138_v48, %v1049_v47 }
 0x250   :  { %v1053_v50 = vpop.f32.mrf.mxu0  ;;  %v1142_v51 = vpop.f32.mrf.mxu1 }
 0x251   :  { %1179 = vst [vmem:[#allocation11 + $0x28] sm:$0xff] %v1139_v49  ;;  %v1143_v52 = vadd.f32 %v1142_v51, %v1053_v50 }
 0x252   :  { %v1055_v53 = vpop.f32.mrf.mxu0  ;;  %v1144_v54 = vpop.f32.mrf.mxu1 }
 0x253   :  { %1180 = vst [vmem:[#allocation11 + $0x30] sm:$0xff] %v1143_v52  ;;  %v1145_v55 = vadd.f32 %v1144_v54, %v1055_v53 }
 0x255   :  { %1181 = vst [vmem:[#allocation11 + $0x38] sm:$0xff] %v1145_v55 }
 0x256   :  { %1381 = shalt.err (!%p1378_p10)
}
 0x257   :  { %1193 = dma.vmem_to_hbm [thread:$0]  %s1188_s3, 1024, %s1578_s4, [#allocation5], %s1402_s25, %s1402_s25, %s1403_s26  }
 0x258   :  { %1396 = dma.done.wait [#allocation5], 1024  }
 0x259   :  { %1397 = vsyncadd [#allocation5], 4294966272 }
 0x25a   :  { %1197 = vsyncpa [#allocation4], 1 }
 0x25b   :  { %1198 = vsyncpa [#allocation7], 1 }
 0x25c   :  { %1199 = vsyncpa [#allocation10], 1 }
 0x25d   :  { %1200 = vsyncpa [#allocation5], 1 }

</bundles_post_ra>
